<compile_context>
chip_gen: v7x
topology: tpu7x:2x2x1
jax: 0.10.0
libtpu: 0.0.40
codegen_flags: <defaults>
</compile_context>

<pallas_src>
import math

import jax
import jax.numpy as jnp
from jax.experimental import pallas as pl
from jax.experimental.pallas import tpu as pltpu


# ----------------------------- config (small, lane-aligned) ------------------
B = 2          # batch
T = 16         # sequence length
C = 128        # n_embd (multiple of 128 -> lane-dense refs)
H = 4          # n_head
D = C // H     # head dim
N = B * T      # folded token rows
EPS = 1e-5     # nn.LayerNorm default
NEG = -1e30    # finite mask value (avoids -inf special handling)


def _layernorm(h, w, b):
    mu = jnp.mean(h, axis=-1, keepdims=True)
    var = jnp.mean((h - mu) ** 2, axis=-1, keepdims=True)
    return (h - mu) * jax.lax.rsqrt(var + EPS) * w + b


def _gelu_tanh(x):
    # nn.GELU(approximate='tanh')
    c = math.sqrt(2.0 / math.pi)
    return 0.5 * x * (1.0 + jnp.tanh(c * (x + 0.044715 * x * x * x)))


def block_kernel(x_ref,
                 ln1w_ref, ln1b_ref,
                 wqkv_ref, bqkv_ref,
                 wproj_ref, bproj_ref,
                 ln2w_ref, ln2b_ref,
                 wfc_ref, bfc_ref,
                 wmp_ref, bmp_ref,
                 o_ref, y_sc):
    x = x_ref[...]                                   # (N, C) f32, all tokens of all batches

    # (T, T) causal additive mask built in-kernel (VPU work, free under MXU slack).
    row = jax.lax.broadcasted_iota(jnp.int32, (T, T), 0)
    col = jax.lax.broadcasted_iota(jnp.int32, (T, T), 1)
    mask = jnp.where(col <= row, 0.0, NEG).astype(jnp.float32)

    # ---- ln_1 + causal self-attention ---------------------------------------
    h = _layernorm(x, ln1w_ref[...], ln1b_ref[...])                      # f32 elementwise
    qkv = jnp.dot(h.astype(jnp.bfloat16), wqkv_ref[...],
                  preferred_element_type=jnp.float32) + bqkv_ref[...]    # (N, 3C) f32
    q = (qkv[:, 0 * C:1 * C] * (1.0 / math.sqrt(D))).astype(jnp.bfloat16)  # fold 1/sqrt(D)
    k = qkv[:, 1 * C:2 * C].astype(jnp.bfloat16)
    v = qkv[:, 2 * C:3 * C].astype(jnp.bfloat16)

    # Per-batch, per-head attention: static unroll (B*H = 8 tiny MXU ops),
    # contraction over the last dims -> no XLU transpose of k.
    dn = (((1,), (1,)), ((), ()))
    for b in range(B):
        r0, r1 = b * T, (b + 1) * T
        for hh in range(H):
            c0, c1 = hh * D, (hh + 1) * D
            qh = q[r0:r1, c0:c1]                                         # (T, D) bf16
            kh = k[r0:r1, c0:c1]                                         # (T, D) bf16
            vh = v[r0:r1, c0:c1]                                         # (T, D) bf16
            att = jax.lax.dot_general(qh, kh, dn,
                                      preferred_element_type=jnp.float32) + mask
            m = jnp.max(att, axis=-1, keepdims=True)
            e = jnp.exp(att - m)                                         # f32 EUP
            s = jnp.sum(e, axis=-1, keepdims=True)
            p = e * pl.reciprocal(s, approx=True)                        # EUP, not VALU divide
            # Write this head's output into its lane slice (no cross-lane concat).
            y_sc[r0:r1, c0:c1] = jnp.dot(p.astype(jnp.bfloat16), vh,
                                         preferred_element_type=jnp.float32)

    y = jnp.dot(y_sc[...].astype(jnp.bfloat16), wproj_ref[...],
                preferred_element_type=jnp.float32) + bproj_ref[...]     # attn c_proj
    x = x + y                                                            # residual 1

    # ---- ln_2 + MLP ----------------------------------------------------------
    h2 = _layernorm(x, ln2w_ref[...], ln2b_ref[...])
    f = jnp.dot(h2.astype(jnp.bfloat16), wfc_ref[...],
                preferred_element_type=jnp.float32) + bfc_ref[...]       # (N, 4C)
    g = _gelu_tanh(f)                                                    # f32 elementwise
    o_ref[...] = x + jnp.dot(g.astype(jnp.bfloat16), wmp_ref[...],
                             preferred_element_type=jnp.float32) + bmp_ref[...]  # residual 2


def block_forward(x, params):
    (ln1w, ln1b, wqkv, bqkv, wproj, bproj,
     ln2w, ln2b, wfc, bfc, wmp, bmp) = params

    x2d = x.reshape(N, C).astype(jnp.float32)        # fold batch into rows (free reshape)

    # Matmul weights go in as bf16 (MXU operands); LN params and biases stay f32
    # (they are applied after f32 accumulation / in f32 VPU math).
    kernel_params = (
        ln1w, ln1b,
        wqkv.astype(jnp.bfloat16), bqkv,
        wproj.astype(jnp.bfloat16), bproj,
        ln2w, ln2b,
        wfc.astype(jnp.bfloat16), bfc,
        wmp.astype(jnp.bfloat16), bmp,
    )

    vmem = pl.BlockSpec(memory_space=pltpu.MemorySpace.VMEM)             # whole array in VMEM
    out2d = pl.pallas_call(
        block_kernel,
        out_shape=jax.ShapeDtypeStruct((N, C), jnp.float32),
        in_specs=[vmem] * 13,
        out_specs=vmem,
        scratch_shapes=[pltpu.VMEM((N, C), jnp.float32)],                # head-output slab
    )(x2d, *kernel_params)
    return out2d.reshape(B, T, C)


# ----------------------------- pure-JAX reference (for verification) ---------
def block_reference(x, params):
    (ln1w, ln1b, wqkv, bqkv, wproj, bproj,
     ln2w, ln2b, wfc, bfc, wmp, bmp) = params

    def ln(h, w, b):
        mu = h.mean(-1, keepdims=True)
        var = ((h - mu) ** 2).mean(-1, keepdims=True)
        return (h - mu) / jnp.sqrt(var + EPS) * w + b

    h = ln(x, ln1w, ln1b)
    qkv = h @ wqkv + bqkv
    q, k, v = jnp.split(qkv, 3, axis=-1)
    q = q.reshape(B, T, H, D).transpose(0, 2, 1, 3)
    k = k.reshape(B, T, H, D).transpose(0, 2, 1, 3)
    v = v.reshape(B, T, H, D).transpose(0, 2, 1, 3)
    att = (q @ k.transpose(0, 1, 3, 2)) / math.sqrt(D)
    mask = jnp.tril(jnp.ones((T, T), bool))
    att = jnp.where(mask, att, -jnp.inf)
    att = jax.nn.softmax(att, axis=-1)
    y = (att @ v).transpose(0, 2, 1, 3).reshape(B, T, C)
    y = y @ wproj + bproj
    x = x + y
    h2 = ln(x, ln2w, ln2b)
    f = h2 @ wfc + bfc
    g = 0.5 * f * (1.0 + jnp.tanh(math.sqrt(2.0 / math.pi) * (f + 0.044715 * f ** 3)))
    return x + (g @ wmp + bmp)


if __name__ == "__main__":
    key = jax.random.PRNGKey(0)
    keys = jax.random.split(key, 8)

    x = jax.random.normal(keys[0], (B, T, C), jnp.float32)

    std = 0.02
    params = (
        jnp.ones((1, C), jnp.float32),                                    # ln_1.weight
        jnp.zeros((1, C), jnp.float32),                                   # ln_1.bias
        jax.random.normal(keys[1], (C, 3 * C), jnp.float32) * std,        # c_attn.weight
        jax.random.normal(keys[2], (1, 3 * C), jnp.float32) * std,        # c_attn.bias
        jax.random.normal(keys[3], (C, C), jnp.float32) * std,            # attn c_proj.weight
        jnp.zeros((1, C), jnp.float32),                                   # attn c_proj.bias
        jnp.ones((1, C), jnp.float32),                                    # ln_2.weight
        jnp.zeros((1, C), jnp.float32),                                   # ln_2.bias
        jax.random.normal(keys[4], (C, 4 * C), jnp.float32) * std,        # mlp c_fc.weight
        jax.random.normal(keys[5], (1, 4 * C), jnp.float32) * std,        # mlp c_fc.bias
        jax.random.normal(keys[6], (4 * C, C), jnp.float32) * std,        # mlp c_proj.weight
        jnp.zeros((1, C), jnp.float32),                                   # mlp c_proj.bias
    )

    out = jax.block_until_ready(block_forward(x, params))
    ref = block_reference(x, params)

    assert out.shape == (B, T, C)
    err = float(jnp.max(jnp.abs(out - ref)))
    # Tolerance loosened for bf16 MXU operands + approx-reciprocal softmax vs the
    # pure-f32 reference (observed error is O(1e-3) at these magnitudes).
    assert jnp.allclose(out, ref, atol=2e-2, rtol=2e-2), f"max abs err {err}"

    print("KERNEL_OK")
</pallas_src>

<mosaic_0001>
module attributes {stable_mosaic.version = 11 : i64} {
  func.func @block_kernel(%arg0: memref<32x128xf32, #tpu.memory_space<vmem>>, %arg1: memref<1x128xf32, #tpu.memory_space<vmem>>, %arg2: memref<1x128xf32, #tpu.memory_space<vmem>>, %arg3: memref<128x384xbf16, #tpu.memory_space<vmem>>, %arg4: memref<1x384xf32, #tpu.memory_space<vmem>>, %arg5: memref<128x128xbf16, #tpu.memory_space<vmem>>, %arg6: memref<1x128xf32, #tpu.memory_space<vmem>>, %arg7: memref<1x128xf32, #tpu.memory_space<vmem>>, %arg8: memref<1x128xf32, #tpu.memory_space<vmem>>, %arg9: memref<128x512xbf16, #tpu.memory_space<vmem>>, %arg10: memref<1x512xf32, #tpu.memory_space<vmem>>, %arg11: memref<512x128xbf16, #tpu.memory_space<vmem>>, %arg12: memref<1x128xf32, #tpu.memory_space<vmem>>, %arg13: memref<32x128xf32, #tpu.memory_space<vmem>>, %arg14: memref<32x128xf32, #tpu.memory_space<vmem>>) attributes {dimension_semantics = [], scalar_prefetch = 0 : i64, scratch_operands = 1 : i64, tpu.core_type = #tpu.core_type<tc>} {
    %c0 = arith.constant 0 : index
    %c0_0 = arith.constant 0 : index
    %0 = vector.load %arg0[%c0, %c0_0] : memref<32x128xf32, #tpu.memory_space<vmem>>, vector<32x128xf32>
    %1 = tpu.iota {dimensions = array<i32: 0>} : vector<16x16xi32>
    %2 = tpu.iota {dimensions = array<i32: 1>} : vector<16x16xi32>
    %3 = arith.cmpi sle, %2, %1 : vector<16x16xi32>
    %cst = arith.constant 0.000000e+00 : f32
    %cst_1 = arith.constant -1.000000e+30 : f32
    %4 = vector.broadcast %cst : f32 to vector<16x16xf32>
    %5 = vector.broadcast %cst_1 : f32 to vector<16x16xf32>
    %6 = arith.select %3, %4, %5 : vector<16x16xi1>, vector<16x16xf32>
    %c0_2 = arith.constant 0 : index
    %c0_3 = arith.constant 0 : index
    %7 = vector.load %arg1[%c0_2, %c0_3] : memref<1x128xf32, #tpu.memory_space<vmem>>, vector<1x128xf32>
    %c0_4 = arith.constant 0 : index
    %c0_5 = arith.constant 0 : index
    %8 = vector.load %arg2[%c0_4, %c0_5] : memref<1x128xf32, #tpu.memory_space<vmem>>, vector<1x128xf32>
    %cst_6 = arith.constant dense<0.000000e+00> : vector<32xf32>
    %9 = vector.multi_reduction <add>, %0, %cst_6 [1] : vector<32x128xf32> to vector<32xf32>
    %10 = vector.shape_cast %9 : vector<32xf32> to vector<32x1xf32>
    %cst_7 = arith.constant 1.280000e+02 : f32
    %11 = vector.broadcast %cst_7 : f32 to vector<32x1xf32>
    %12 = arith.divf %10, %11 : vector<32x1xf32>
    %13 = vector.broadcast %12 : vector<32x1xf32> to vector<32x128xf32>
    %14 = arith.subf %0, %13 : vector<32x128xf32>
    %15 = arith.mulf %14, %14 : vector<32x128xf32>
    %cst_8 = arith.constant dense<0.000000e+00> : vector<32xf32>
    %16 = vector.multi_reduction <add>, %15, %cst_8 [1] : vector<32x128xf32> to vector<32xf32>
    %17 = vector.shape_cast %16 : vector<32xf32> to vector<32x1xf32>
    %cst_9 = arith.constant 1.280000e+02 : f32
    %18 = vector.broadcast %cst_9 : f32 to vector<32x1xf32>
    %19 = arith.divf %17, %18 : vector<32x1xf32>
    %20 = vector.broadcast %12 : vector<32x1xf32> to vector<32x128xf32>
    %21 = arith.subf %0, %20 : vector<32x128xf32>
    %cst_10 = arith.constant 9.99999974E-6 : f32
    %22 = vector.broadcast %cst_10 : f32 to vector<32x1xf32>
    %23 = arith.addf %19, %22 : vector<32x1xf32>
    %24 = math.rsqrt %23 : vector<32x1xf32>
    %25 = vector.broadcast %24 : vector<32x1xf32> to vector<32x128xf32>
    %26 = arith.mulf %21, %25 : vector<32x128xf32>
    %27 = vector.broadcast %7 : vector<1x128xf32> to vector<32x128xf32>
    %28 = arith.mulf %26, %27 : vector<32x128xf32>
    %29 = vector.broadcast %8 : vector<1x128xf32> to vector<32x128xf32>
    %30 = arith.addf %28, %29 : vector<32x128xf32>
    %31 = arith.truncf %30 : vector<32x128xf32> to vector<32x128xbf16>
    %c0_11 = arith.constant 0 : index
    %c0_12 = arith.constant 0 : index
    %32 = vector.load %arg3[%c0_11, %c0_12] : memref<128x384xbf16, #tpu.memory_space<vmem>>, vector<128x384xbf16>
    %cst_13 = arith.constant dense<0.000000e+00> : vector<32x384xf32>
    %33 = tpu.matmul %31, %32, %cst_13 {dimension_numbers = #tpu.dot_dimension_numbers<[1], [0], [0], [1], [0, 0, 1, 1], [], []>} : vector<32x128xbf16>, vector<128x384xbf16>, vector<32x384xf32> -> vector<32x384xf32>
    %c0_14 = arith.constant 0 : index
    %c0_15 = arith.constant 0 : index
    %34 = vector.load %arg4[%c0_14, %c0_15] : memref<1x384xf32, #tpu.memory_space<vmem>>, vector<1x384xf32>
    %35 = vector.broadcast %34 : vector<1x384xf32> to vector<32x384xf32>
    %36 = arith.addf %33, %35 : vector<32x384xf32>
    %37 = vector.extract_strided_slice %36 {offsets = [0, 0], sizes = [32, 128], strides = [1, 1]} : vector<32x384xf32> to vector<32x128xf32>
    %cst_16 = arith.constant 0.176776692 : f32
    %38 = vector.broadcast %cst_16 : f32 to vector<32x128xf32>
    %39 = arith.mulf %37, %38 : vector<32x128xf32>
    %40 = arith.truncf %39 : vector<32x128xf32> to vector<32x128xbf16>
    %41 = vector.extract_strided_slice %36 {offsets = [0, 128], sizes = [32, 128], strides = [1, 1]} : vector<32x384xf32> to vector<32x128xf32>
    %42 = arith.truncf %41 : vector<32x128xf32> to vector<32x128xbf16>
    %43 = vector.extract_strided_slice %36 {offsets = [0, 256], sizes = [32, 128], strides = [1, 1]} : vector<32x384xf32> to vector<32x128xf32>
    %44 = arith.truncf %43 : vector<32x128xf32> to vector<32x128xbf16>
    %45 = vector.extract_strided_slice %40 {offsets = [0, 0], sizes = [16, 32], strides = [1, 1]} : vector<32x128xbf16> to vector<16x32xbf16>
    %46 = vector.extract_strided_slice %42 {offsets = [0, 0], sizes = [16, 32], strides = [1, 1]} : vector<32x128xbf16> to vector<16x32xbf16>
    %47 = vector.extract_strided_slice %44 {offsets = [0, 0], sizes = [16, 32], strides = [1, 1]} : vector<32x128xbf16> to vector<16x32xbf16>
    %cst_17 = arith.constant dense<0.000000e+00> : vector<16x16xf32>
    %48 = tpu.matmul %45, %46, %cst_17 {dimension_numbers = #tpu.dot_dimension_numbers<[1], [1], [0], [0], [0, 0, 1, 0], [], []>} : vector<16x32xbf16>, vector<16x32xbf16>, vector<16x16xf32> -> vector<16x16xf32>
    %49 = arith.addf %48, %6 : vector<16x16xf32>
    %cst_18 = arith.constant dense<0xFF800000> : vector<16xf32>
    %50 = vector.multi_reduction <maximumf>, %49, %cst_18 [1] : vector<16x16xf32> to vector<16xf32>
    %51 = vector.shape_cast %50 : vector<16xf32> to vector<16x1xf32>
    %52 = vector.broadcast %51 : vector<16x1xf32> to vector<16x16xf32>
    %53 = arith.subf %49, %52 : vector<16x16xf32>
    %54 = math.exp %53 : vector<16x16xf32>
    %cst_19 = arith.constant dense<0.000000e+00> : vector<16xf32>
    %55 = vector.multi_reduction <add>, %54, %cst_19 [1] : vector<16x16xf32> to vector<16xf32>
    %56 = vector.shape_cast %55 : vector<16xf32> to vector<16x1xf32>
    %57 = tpu.reciprocal %56 {approx = true} : vector<16x1xf32> -> vector<16x1xf32>
    %58 = vector.broadcast %57 : vector<16x1xf32> to vector<16x16xf32>
    %59 = arith.mulf %54, %58 : vector<16x16xf32>
    %60 = arith.truncf %59 : vector<16x16xf32> to vector<16x16xbf16>
    %cst_20 = arith.constant dense<0.000000e+00> : vector<16x32xf32>
    %61 = tpu.matmul %60, %47, %cst_20 {dimension_numbers = #tpu.dot_dimension_numbers<[1], [0], [0], [1], [0, 0, 1, 1], [], []>} : vector<16x16xbf16>, vector<16x32xbf16>, vector<16x32xf32> -> vector<16x32xf32>
    %c0_21 = arith.constant 0 : index
    %c0_22 = arith.constant 0 : index
    %62 = vector.load %arg14[%c0_21, %c0_22] : memref<32x128xf32, #tpu.memory_space<vmem>>, vector<16x32xf32>
    tpu.vector_store %arg14[%c0_21, %c0_22], %61 {strides = array<i32>} : memref<32x128xf32, #tpu.memory_space<vmem>>, vector<16x32xf32>,
    %63 = vector.extract_strided_slice %40 {offsets = [0, 32], sizes = [16, 32], strides = [1, 1]} : vector<32x128xbf16> to vector<16x32xbf16>
    %64 = vector.extract_strided_slice %42 {offsets = [0, 32], sizes = [16, 32], strides = [1, 1]} : vector<32x128xbf16> to vector<16x32xbf16>
    %65 = vector.extract_strided_slice %44 {offsets = [0, 32], sizes = [16, 32], strides = [1, 1]} : vector<32x128xbf16> to vector<16x32xbf16>
    %cst_23 = arith.constant dense<0.000000e+00> : vector<16x16xf32>
    %66 = tpu.matmul %63, %64, %cst_23 {dimension_numbers = #tpu.dot_dimension_numbers<[1], [1], [0], [0], [0, 0, 1, 0], [], []>} : vector<16x32xbf16>, vector<16x32xbf16>, vector<16x16xf32> -> vector<16x16xf32>
    %67 = arith.addf %66, %6 : vector<16x16xf32>
    %cst_24 = arith.constant dense<0xFF800000> : vector<16xf32>
    %68 = vector.multi_reduction <maximumf>, %67, %cst_24 [1] : vector<16x16xf32> to vector<16xf32>
    %69 = vector.shape_cast %68 : vector<16xf32> to vector<16x1xf32>
    %70 = vector.broadcast %69 : vector<16x1xf32> to vector<16x16xf32>
    %71 = arith.subf %67, %70 : vector<16x16xf32>
    %72 = math.exp %71 : vector<16x16xf32>
    %cst_25 = arith.constant dense<0.000000e+00> : vector<16xf32>
    %73 = vector.multi_reduction <add>, %72, %cst_25 [1] : vector<16x16xf32> to vector<16xf32>
    %74 = vector.shape_cast %73 : vector<16xf32> to vector<16x1xf32>
    %75 = tpu.reciprocal %74 {approx = true} : vector<16x1xf32> -> vector<16x1xf32>
    %76 = vector.broadcast %75 : vector<16x1xf32> to vector<16x16xf32>
    %77 = arith.mulf %72, %76 : vector<16x16xf32>
    %78 = arith.truncf %77 : vector<16x16xf32> to vector<16x16xbf16>
    %cst_26 = arith.constant dense<0.000000e+00> : vector<16x32xf32>
    %79 = tpu.matmul %78, %65, %cst_26 {dimension_numbers = #tpu.dot_dimension_numbers<[1], [0], [0], [1], [0, 0, 1, 1], [], []>} : vector<16x16xbf16>, vector<16x32xbf16>, vector<16x32xf32> -> vector<16x32xf32>
    %c0_27 = arith.constant 0 : index
    %c32 = arith.constant 32 : index
    %80 = vector.load %arg14[%c0_27, %c32] : memref<32x128xf32, #tpu.memory_space<vmem>>, vector<16x32xf32>
    tpu.vector_store %arg14[%c0_27, %c32], %79 {strides = array<i32>} : memref<32x128xf32, #tpu.memory_space<vmem>>, vector<16x32xf32>,
    %81 = vector.extract_strided_slice %40 {offsets = [0, 64], sizes = [16, 32], strides = [1, 1]} : vector<32x128xbf16> to vector<16x32xbf16>
    %82 = vector.extract_strided_slice %42 {offsets = [0, 64], sizes = [16, 32], strides = [1, 1]} : vector<32x128xbf16> to vector<16x32xbf16>
    %83 = vector.extract_strided_slice %44 {offsets = [0, 64], sizes = [16, 32], strides = [1, 1]} : vector<32x128xbf16> to vector<16x32xbf16>
    %cst_28 = arith.constant dense<0.000000e+00> : vector<16x16xf32>
    %84 = tpu.matmul %81, %82, %cst_28 {dimension_numbers = #tpu.dot_dimension_numbers<[1], [1], [0], [0], [0, 0, 1, 0], [], []>} : vector<16x32xbf16>, vector<16x32xbf16>, vector<16x16xf32> -> vector<16x16xf32>
    %85 = arith.addf %84, %6 : vector<16x16xf32>
    %cst_29 = arith.constant dense<0xFF800000> : vector<16xf32>
    %86 = vector.multi_reduction <maximumf>, %85, %cst_29 [1] : vector<16x16xf32> to vector<16xf32>
    %87 = vector.shape_cast %86 : vector<16xf32> to vector<16x1xf32>
    %88 = vector.broadcast %87 : vector<16x1xf32> to vector<16x16xf32>
    %89 = arith.subf %85, %88 : vector<16x16xf32>
    %90 = math.exp %89 : vector<16x16xf32>
    %cst_30 = arith.constant dense<0.000000e+00> : vector<16xf32>
    %91 = vector.multi_reduction <add>, %90, %cst_30 [1] : vector<16x16xf32> to vector<16xf32>
    %92 = vector.shape_cast %91 : vector<16xf32> to vector<16x1xf32>
    %93 = tpu.reciprocal %92 {approx = true} : vector<16x1xf32> -> vector<16x1xf32>
    %94 = vector.broadcast %93 : vector<16x1xf32> to vector<16x16xf32>
    %95 = arith.mulf %90, %94 : vector<16x16xf32>
    %96 = arith.truncf %95 : vector<16x16xf32> to vector<16x16xbf16>
    %cst_31 = arith.constant dense<0.000000e+00> : vector<16x32xf32>
    %97 = tpu.matmul %96, %83, %cst_31 {dimension_numbers = #tpu.dot_dimension_numbers<[1], [0], [0], [1], [0, 0, 1, 1], [], []>} : vector<16x16xbf16>, vector<16x32xbf16>, vector<16x32xf32> -> vector<16x32xf32>
    %c0_32 = arith.constant 0 : index
    %c64 = arith.constant 64 : index
    %98 = vector.load %arg14[%c0_32, %c64] : memref<32x128xf32, #tpu.memory_space<vmem>>, vector<16x32xf32>
    tpu.vector_store %arg14[%c0_32, %c64], %97 {strides = array<i32>} : memref<32x128xf32, #tpu.memory_space<vmem>>, vector<16x32xf32>,
    %99 = vector.extract_strided_slice %40 {offsets = [0, 96], sizes = [16, 32], strides = [1, 1]} : vector<32x128xbf16> to vector<16x32xbf16>
    %100 = vector.extract_strided_slice %42 {offsets = [0, 96], sizes = [16, 32], strides = [1, 1]} : vector<32x128xbf16> to vector<16x32xbf16>
    %101 = vector.extract_strided_slice %44 {offsets = [0, 96], sizes = [16, 32], strides = [1, 1]} : vector<32x128xbf16> to vector<16x32xbf16>
    %cst_33 = arith.constant dense<0.000000e+00> : vector<16x16xf32>
    %102 = tpu.matmul %99, %100, %cst_33 {dimension_numbers = #tpu.dot_dimension_numbers<[1], [1], [0], [0], [0, 0, 1, 0], [], []>} : vector<16x32xbf16>, vector<16x32xbf16>, vector<16x16xf32> -> vector<16x16xf32>
    %103 = arith.addf %102, %6 : vector<16x16xf32>
    %cst_34 = arith.constant dense<0xFF800000> : vector<16xf32>
    %104 = vector.multi_reduction <maximumf>, %103, %cst_34 [1] : vector<16x16xf32> to vector<16xf32>
    %105 = vector.shape_cast %104 : vector<16xf32> to vector<16x1xf32>
    %106 = vector.broadcast %105 : vector<16x1xf32> to vector<16x16xf32>
    %107 = arith.subf %103, %106 : vector<16x16xf32>
    %108 = math.exp %107 : vector<16x16xf32>
    %cst_35 = arith.constant dense<0.000000e+00> : vector<16xf32>
    %109 = vector.multi_reduction <add>, %108, %cst_35 [1] : vector<16x16xf32> to vector<16xf32>
    %110 = vector.shape_cast %109 : vector<16xf32> to vector<16x1xf32>
    %111 = tpu.reciprocal %110 {approx = true} : vector<16x1xf32> -> vector<16x1xf32>
    %112 = vector.broadcast %111 : vector<16x1xf32> to vector<16x16xf32>
    %113 = arith.mulf %108, %112 : vector<16x16xf32>
    %114 = arith.truncf %113 : vector<16x16xf32> to vector<16x16xbf16>
    %cst_36 = arith.constant dense<0.000000e+00> : vector<16x32xf32>
    %115 = tpu.matmul %114, %101, %cst_36 {dimension_numbers = #tpu.dot_dimension_numbers<[1], [0], [0], [1], [0, 0, 1, 1], [], []>} : vector<16x16xbf16>, vector<16x32xbf16>, vector<16x32xf32> -> vector<16x32xf32>
    %c0_37 = arith.constant 0 : index
    %c96 = arith.constant 96 : index
    %116 = vector.load %arg14[%c0_37, %c96] : memref<32x128xf32, #tpu.memory_space<vmem>>, vector<16x32xf32>
    tpu.vector_store %arg14[%c0_37, %c96], %115 {strides = array<i32>} : memref<32x128xf32, #tpu.memory_space<vmem>>, vector<16x32xf32>,
    %117 = vector.extract_strided_slice %40 {offsets = [16, 0], sizes = [16, 32], strides = [1, 1]} : vector<32x128xbf16> to vector<16x32xbf16>
    %118 = vector.extract_strided_slice %42 {offsets = [16, 0], sizes = [16, 32], strides = [1, 1]} : vector<32x128xbf16> to vector<16x32xbf16>
    %119 = vector.extract_strided_slice %44 {offsets = [16, 0], sizes = [16, 32], strides = [1, 1]} : vector<32x128xbf16> to vector<16x32xbf16>
    %cst_38 = arith.constant dense<0.000000e+00> : vector<16x16xf32>
    %120 = tpu.matmul %117, %118, %cst_38 {dimension_numbers = #tpu.dot_dimension_numbers<[1], [1], [0], [0], [0, 0, 1, 0], [], []>} : vector<16x32xbf16>, vector<16x32xbf16>, vector<16x16xf32> -> vector<16x16xf32>
    %121 = arith.addf %120, %6 : vector<16x16xf32>
    %cst_39 = arith.constant dense<0xFF800000> : vector<16xf32>
    %122 = vector.multi_reduction <maximumf>, %121, %cst_39 [1] : vector<16x16xf32> to vector<16xf32>
    %123 = vector.shape_cast %122 : vector<16xf32> to vector<16x1xf32>
    %124 = vector.broadcast %123 : vector<16x1xf32> to vector<16x16xf32>
    %125 = arith.subf %121, %124 : vector<16x16xf32>
    %126 = math.exp %125 : vector<16x16xf32>
    %cst_40 = arith.constant dense<0.000000e+00> : vector<16xf32>
    %127 = vector.multi_reduction <add>, %126, %cst_40 [1] : vector<16x16xf32> to vector<16xf32>
    %128 = vector.shape_cast %127 : vector<16xf32> to vector<16x1xf32>
    %129 = tpu.reciprocal %128 {approx = true} : vector<16x1xf32> -> vector<16x1xf32>
    %130 = vector.broadcast %129 : vector<16x1xf32> to vector<16x16xf32>
    %131 = arith.mulf %126, %130 : vector<16x16xf32>
    %132 = arith.truncf %131 : vector<16x16xf32> to vector<16x16xbf16>
    %cst_41 = arith.constant dense<0.000000e+00> : vector<16x32xf32>
    %133 = tpu.matmul %132, %119, %cst_41 {dimension_numbers = #tpu.dot_dimension_numbers<[1], [0], [0], [1], [0, 0, 1, 1], [], []>} : vector<16x16xbf16>, vector<16x32xbf16>, vector<16x32xf32> -> vector<16x32xf32>
    %c16 = arith.constant 16 : index
    %c0_42 = arith.constant 0 : index
    %134 = vector.load %arg14[%c16, %c0_42] : memref<32x128xf32, #tpu.memory_space<vmem>>, vector<16x32xf32>
    tpu.vector_store %arg14[%c16, %c0_42], %133 {strides = array<i32>} : memref<32x128xf32, #tpu.memory_space<vmem>>, vector<16x32xf32>,
    %135 = vector.extract_strided_slice %40 {offsets = [16, 32], sizes = [16, 32], strides = [1, 1]} : vector<32x128xbf16> to vector<16x32xbf16>
    %136 = vector.extract_strided_slice %42 {offsets = [16, 32], sizes = [16, 32], strides = [1, 1]} : vector<32x128xbf16> to vector<16x32xbf16>
    %137 = vector.extract_strided_slice %44 {offsets = [16, 32], sizes = [16, 32], strides = [1, 1]} : vector<32x128xbf16> to vector<16x32xbf16>
    %cst_43 = arith.constant dense<0.000000e+00> : vector<16x16xf32>
    %138 = tpu.matmul %135, %136, %cst_43 {dimension_numbers = #tpu.dot_dimension_numbers<[1], [1], [0], [0], [0, 0, 1, 0], [], []>} : vector<16x32xbf16>, vector<16x32xbf16>, vector<16x16xf32> -> vector<16x16xf32>
    %139 = arith.addf %138, %6 : vector<16x16xf32>
    %cst_44 = arith.constant dense<0xFF800000> : vector<16xf32>
    %140 = vector.multi_reduction <maximumf>, %139, %cst_44 [1] : vector<16x16xf32> to vector<16xf32>
    %141 = vector.shape_cast %140 : vector<16xf32> to vector<16x1xf32>
    %142 = vector.broadcast %141 : vector<16x1xf32> to vector<16x16xf32>
    %143 = arith.subf %139, %142 : vector<16x16xf32>
    %144 = math.exp %143 : vector<16x16xf32>
    %cst_45 = arith.constant dense<0.000000e+00> : vector<16xf32>
    %145 = vector.multi_reduction <add>, %144, %cst_45 [1] : vector<16x16xf32> to vector<16xf32>
    %146 = vector.shape_cast %145 : vector<16xf32> to vector<16x1xf32>
    %147 = tpu.reciprocal %146 {approx = true} : vector<16x1xf32> -> vector<16x1xf32>
    %148 = vector.broadcast %147 : vector<16x1xf32> to vector<16x16xf32>
    %149 = arith.mulf %144, %148 : vector<16x16xf32>
    %150 = arith.truncf %149 : vector<16x16xf32> to vector<16x16xbf16>
    %cst_46 = arith.constant dense<0.000000e+00> : vector<16x32xf32>
    %151 = tpu.matmul %150, %137, %cst_46 {dimension_numbers = #tpu.dot_dimension_numbers<[1], [0], [0], [1], [0, 0, 1, 1], [], []>} : vector<16x16xbf16>, vector<16x32xbf16>, vector<16x32xf32> -> vector<16x32xf32>
    %c16_47 = arith.constant 16 : index
    %c32_48 = arith.constant 32 : index
    %152 = vector.load %arg14[%c16_47, %c32_48] : memref<32x128xf32, #tpu.memory_space<vmem>>, vector<16x32xf32>
    tpu.vector_store %arg14[%c16_47, %c32_48], %151 {strides = array<i32>} : memref<32x128xf32, #tpu.memory_space<vmem>>, vector<16x32xf32>,
    %153 = vector.extract_strided_slice %40 {offsets = [16, 64], sizes = [16, 32], strides = [1, 1]} : vector<32x128xbf16> to vector<16x32xbf16>
    %154 = vector.extract_strided_slice %42 {offsets = [16, 64], sizes = [16, 32], strides = [1, 1]} : vector<32x128xbf16> to vector<16x32xbf16>
    %155 = vector.extract_strided_slice %44 {offsets = [16, 64], sizes = [16, 32], strides = [1, 1]} : vector<32x128xbf16> to vector<16x32xbf16>
    %cst_49 = arith.constant dense<0.000000e+00> : vector<16x16xf32>
    %156 = tpu.matmul %153, %154, %cst_49 {dimension_numbers = #tpu.dot_dimension_numbers<[1], [1], [0], [0], [0, 0, 1, 0], [], []>} : vector<16x32xbf16>, vector<16x32xbf16>, vector<16x16xf32> -> vector<16x16xf32>
    %157 = arith.addf %156, %6 : vector<16x16xf32>
    %cst_50 = arith.constant dense<0xFF800000> : vector<16xf32>
    %158 = vector.multi_reduction <maximumf>, %157, %cst_50 [1] : vector<16x16xf32> to vector<16xf32>
    %159 = vector.shape_cast %158 : vector<16xf32> to vector<16x1xf32>
    %160 = vector.broadcast %159 : vector<16x1xf32> to vector<16x16xf32>
    %161 = arith.subf %157, %160 : vector<16x16xf32>
    %162 = math.exp %161 : vector<16x16xf32>
    %cst_51 = arith.constant dense<0.000000e+00> : vector<16xf32>
    %163 = vector.multi_reduction <add>, %162, %cst_51 [1] : vector<16x16xf32> to vector<16xf32>
    %164 = vector.shape_cast %163 : vector<16xf32> to vector<16x1xf32>
    %165 = tpu.reciprocal %164 {approx = true} : vector<16x1xf32> -> vector<16x1xf32>
    %166 = vector.broadcast %165 : vector<16x1xf32> to vector<16x16xf32>
    %167 = arith.mulf %162, %166 : vector<16x16xf32>
    %168 = arith.truncf %167 : vector<16x16xf32> to vector<16x16xbf16>
    %cst_52 = arith.constant dense<0.000000e+00> : vector<16x32xf32>
    %169 = tpu.matmul %168, %155, %cst_52 {dimension_numbers = #tpu.dot_dimension_numbers<[1], [0], [0], [1], [0, 0, 1, 1], [], []>} : vector<16x16xbf16>, vector<16x32xbf16>, vector<16x32xf32> -> vector<16x32xf32>
    %c16_53 = arith.constant 16 : index
    %c64_54 = arith.constant 64 : index
    %170 = vector.load %arg14[%c16_53, %c64_54] : memref<32x128xf32, #tpu.memory_space<vmem>>, vector<16x32xf32>
    tpu.vector_store %arg14[%c16_53, %c64_54], %169 {strides = array<i32>} : memref<32x128xf32, #tpu.memory_space<vmem>>, vector<16x32xf32>,
    %171 = vector.extract_strided_slice %40 {offsets = [16, 96], sizes = [16, 32], strides = [1, 1]} : vector<32x128xbf16> to vector<16x32xbf16>
    %172 = vector.extract_strided_slice %42 {offsets = [16, 96], sizes = [16, 32], strides = [1, 1]} : vector<32x128xbf16> to vector<16x32xbf16>
    %173 = vector.extract_strided_slice %44 {offsets = [16, 96], sizes = [16, 32], strides = [1, 1]} : vector<32x128xbf16> to vector<16x32xbf16>
    %cst_55 = arith.constant dense<0.000000e+00> : vector<16x16xf32>
    %174 = tpu.matmul %171, %172, %cst_55 {dimension_numbers = #tpu.dot_dimension_numbers<[1], [1], [0], [0], [0, 0, 1, 0], [], []>} : vector<16x32xbf16>, vector<16x32xbf16>, vector<16x16xf32> -> vector<16x16xf32>
    %175 = arith.addf %174, %6 : vector<16x16xf32>
    %cst_56 = arith.constant dense<0xFF800000> : vector<16xf32>
    %176 = vector.multi_reduction <maximumf>, %175, %cst_56 [1] : vector<16x16xf32> to vector<16xf32>
    %177 = vector.shape_cast %176 : vector<16xf32> to vector<16x1xf32>
    %178 = vector.broadcast %177 : vector<16x1xf32> to vector<16x16xf32>
    %179 = arith.subf %175, %178 : vector<16x16xf32>
    %180 = math.exp %179 : vector<16x16xf32>
    %cst_57 = arith.constant dense<0.000000e+00> : vector<16xf32>
    %181 = vector.multi_reduction <add>, %180, %cst_57 [1] : vector<16x16xf32> to vector<16xf32>
    %182 = vector.shape_cast %181 : vector<16xf32> to vector<16x1xf32>
    %183 = tpu.reciprocal %182 {approx = true} : vector<16x1xf32> -> vector<16x1xf32>
    %184 = vector.broadcast %183 : vector<16x1xf32> to vector<16x16xf32>
    %185 = arith.mulf %180, %184 : vector<16x16xf32>
    %186 = arith.truncf %185 : vector<16x16xf32> to vector<16x16xbf16>
    %cst_58 = arith.constant dense<0.000000e+00> : vector<16x32xf32>
    %187 = tpu.matmul %186, %173, %cst_58 {dimension_numbers = #tpu.dot_dimension_numbers<[1], [0], [0], [1], [0, 0, 1, 1], [], []>} : vector<16x16xbf16>, vector<16x32xbf16>, vector<16x32xf32> -> vector<16x32xf32>
    %c16_59 = arith.constant 16 : index
    %c96_60 = arith.constant 96 : index
    %188 = vector.load %arg14[%c16_59, %c96_60] : memref<32x128xf32, #tpu.memory_space<vmem>>, vector<16x32xf32>
    tpu.vector_store %arg14[%c16_59, %c96_60], %187 {strides = array<i32>} : memref<32x128xf32, #tpu.memory_space<vmem>>, vector<16x32xf32>,
    %c0_61 = arith.constant 0 : index
    %c0_62 = arith.constant 0 : index
    %189 = vector.load %arg14[%c0_61, %c0_62] : memref<32x128xf32, #tpu.memory_space<vmem>>, vector<32x128xf32>
    %190 = arith.truncf %189 : vector<32x128xf32> to vector<32x128xbf16>
    %c0_63 = arith.constant 0 : index
    %c0_64 = arith.constant 0 : index
    %191 = vector.load %arg5[%c0_63, %c0_64] : memref<128x128xbf16, #tpu.memory_space<vmem>>, vector<128x128xbf16>
    %cst_65 = arith.constant dense<0.000000e+00> : vector<32x128xf32>
    %192 = tpu.matmul %190, %191, %cst_65 {dimension_numbers = #tpu.dot_dimension_numbers<[1], [0], [0], [1], [0, 0, 1, 1], [], []>} : vector<32x128xbf16>, vector<128x128xbf16>, vector<32x128xf32> -> vector<32x128xf32>
    %c0_66 = arith.constant 0 : index
    %c0_67 = arith.constant 0 : index
    %193 = vector.load %arg6[%c0_66, %c0_67] : memref<1x128xf32, #tpu.memory_space<vmem>>, vector<1x128xf32>
    %194 = vector.broadcast %193 : vector<1x128xf32> to vector<32x128xf32>
    %195 = arith.addf %192, %194 : vector<32x128xf32>
    %196 = arith.addf %0, %195 : vector<32x128xf32>
    %c0_68 = arith.constant 0 : index
    %c0_69 = arith.constant 0 : index
    %197 = vector.load %arg7[%c0_68, %c0_69] : memref<1x128xf32, #tpu.memory_space<vmem>>, vector<1x128xf32>
    %c0_70 = arith.constant 0 : index
    %c0_71 = arith.constant 0 : index
    %198 = vector.load %arg8[%c0_70, %c0_71] : memref<1x128xf32, #tpu.memory_space<vmem>>, vector<1x128xf32>
    %cst_72 = arith.constant dense<0.000000e+00> : vector<32xf32>
    %199 = vector.multi_reduction <add>, %196, %cst_72 [1] : vector<32x128xf32> to vector<32xf32>
    %200 = vector.shape_cast %199 : vector<32xf32> to vector<32x1xf32>
    %cst_73 = arith.constant 1.280000e+02 : f32
    %201 = vector.broadcast %cst_73 : f32 to vector<32x1xf32>
    %202 = arith.divf %200, %201 : vector<32x1xf32>
    %203 = vector.broadcast %202 : vector<32x1xf32> to vector<32x128xf32>
    %204 = arith.subf %196, %203 : vector<32x128xf32>
    %205 = arith.mulf %204, %204 : vector<32x128xf32>
    %cst_74 = arith.constant dense<0.000000e+00> : vector<32xf32>
    %206 = vector.multi_reduction <add>, %205, %cst_74 [1] : vector<32x128xf32> to vector<32xf32>
    %207 = vector.shape_cast %206 : vector<32xf32> to vector<32x1xf32>
    %cst_75 = arith.constant 1.280000e+02 : f32
    %208 = vector.broadcast %cst_75 : f32 to vector<32x1xf32>
    %209 = arith.divf %207, %208 : vector<32x1xf32>
    %210 = vector.broadcast %202 : vector<32x1xf32> to vector<32x128xf32>
    %211 = arith.subf %196, %210 : vector<32x128xf32>
    %cst_76 = arith.constant 9.99999974E-6 : f32
    %212 = vector.broadcast %cst_76 : f32 to vector<32x1xf32>
    %213 = arith.addf %209, %212 : vector<32x1xf32>
    %214 = math.rsqrt %213 : vector<32x1xf32>
    %215 = vector.broadcast %214 : vector<32x1xf32> to vector<32x128xf32>
    %216 = arith.mulf %211, %215 : vector<32x128xf32>
    %217 = vector.broadcast %197 : vector<1x128xf32> to vector<32x128xf32>
    %218 = arith.mulf %216, %217 : vector<32x128xf32>
    %219 = vector.broadcast %198 : vector<1x128xf32> to vector<32x128xf32>
    %220 = arith.addf %218, %219 : vector<32x128xf32>
    %221 = arith.truncf %220 : vector<32x128xf32> to vector<32x128xbf16>
    %c0_77 = arith.constant 0 : index
    %c0_78 = arith.constant 0 : index
    %222 = vector.load %arg9[%c0_77, %c0_78] : memref<128x512xbf16, #tpu.memory_space<vmem>>, vector<128x512xbf16>
    %cst_79 = arith.constant dense<0.000000e+00> : vector<32x512xf32>
    %223 = tpu.matmul %221, %222, %cst_79 {dimension_numbers = #tpu.dot_dimension_numbers<[1], [0], [0], [1], [0, 0, 1, 1], [], []>} : vector<32x128xbf16>, vector<128x512xbf16>, vector<32x512xf32> -> vector<32x512xf32>
    %c0_80 = arith.constant 0 : index
    %c0_81 = arith.constant 0 : index
    %224 = vector.load %arg10[%c0_80, %c0_81] : memref<1x512xf32, #tpu.memory_space<vmem>>, vector<1x512xf32>
    %225 = vector.broadcast %224 : vector<1x512xf32> to vector<32x512xf32>
    %226 = arith.addf %223, %225 : vector<32x512xf32>
    %cst_82 = arith.constant 5.000000e-01 : f32
    %227 = vector.broadcast %cst_82 : f32 to vector<32x512xf32>
    %228 = arith.mulf %227, %226 : vector<32x512xf32>
    %cst_83 = arith.constant 4.471500e-02 : f32
    %229 = vector.broadcast %cst_83 : f32 to vector<32x512xf32>
    %230 = arith.mulf %229, %226 : vector<32x512xf32>
    %231 = arith.mulf %230, %226 : vector<32x512xf32>
    %232 = arith.mulf %231, %226 : vector<32x512xf32>
    %233 = arith.addf %226, %232 : vector<32x512xf32>
    %cst_84 = arith.constant 0.797884583 : f32
    %234 = vector.broadcast %cst_84 : f32 to vector<32x512xf32>
    %235 = arith.mulf %234, %233 : vector<32x512xf32>
    %236 = math.tanh %235 : vector<32x512xf32>
    %cst_85 = arith.constant 1.000000e+00 : f32
    %237 = vector.broadcast %cst_85 : f32 to vector<32x512xf32>
    %238 = arith.addf %237, %236 : vector<32x512xf32>
    %239 = arith.mulf %228, %238 : vector<32x512xf32>
    %240 = arith.truncf %239 : vector<32x512xf32> to vector<32x512xbf16>
    %c0_86 = arith.constant 0 : index
    %c0_87 = arith.constant 0 : index
    %241 = vector.load %arg11[%c0_86, %c0_87] : memref<512x128xbf16, #tpu.memory_space<vmem>>, vector<512x128xbf16>
    %cst_88 = arith.constant dense<0.000000e+00> : vector<32x128xf32>
    %242 = tpu.matmul %240, %241, %cst_88 {dimension_numbers = #tpu.dot_dimension_numbers<[1], [0], [0], [1], [0, 0, 1, 1], [], []>} : vector<32x512xbf16>, vector<512x128xbf16>, vector<32x128xf32> -> vector<32x128xf32>
    %243 = arith.addf %196, %242 : vector<32x128xf32>
    %c0_89 = arith.constant 0 : index
    %c0_90 = arith.constant 0 : index
    %244 = vector.load %arg12[%c0_89, %c0_90] : memref<1x128xf32, #tpu.memory_space<vmem>>, vector<1x128xf32>
    %245 = vector.broadcast %244 : vector<1x128xf32> to vector<32x128xf32>
    %246 = arith.addf %243, %245 : vector<32x128xf32>
    %c0_91 = arith.constant 0 : index
    %c0_92 = arith.constant 0 : index
    %247 = vector.load %arg13[%c0_91, %c0_92] : memref<32x128xf32, #tpu.memory_space<vmem>>, vector<32x128xf32>
    tpu.vector_store %arg13[%c0_91, %c0_92], %246 {strides = array<i32>} : memref<32x128xf32, #tpu.memory_space<vmem>>, vector<32x128xf32>,
    return
  }
}

</mosaic_0001>

<bundles_post_ra>
// kernel: tpu_custom_call.1
= control target key start
LH: loop header
LB: loop body
LE: loop exit
PB: predicated region body
PF: predicated region fallthrough
CT: control target
= control target key end

     0   :  { %18 = vsyncpa [#allocation4], 0  ;;  %s4147_s0 = inlined_call_operand.hbm [shape: f32[32,128], index: 0, kind: input, shape index: {}]   ;;  %s4148_s1 = inlined_call_operand.hbm [shape: f32[1,128], index: 1, kind: input, shape index: {}]   ;;  %s4149_s2 = inlined_call_operand.hbm [shape: f32[1,128], index: 2, kind: input, shape index: {}]   ;;  %s4150_s3 = inlined_call_operand.hbm [shape: bf16[128,384], index: 3, kind: input, shape index: {}]   ;;  %s4151_s4 = inlined_call_operand.vmem [shape: f32[1,384], index: 4, kind: input, shape index: {}]   ;;  %s4152_s5 = inlined_call_operand.hbm [shape: bf16[128,128], index: 5, kind: input, shape index: {}]   ;;  %s4153_s6 = inlined_call_operand.vmem [shape: f32[1,128], index: 6, kind: input, shape index: {}]   ;;  %s4154_s7 = inlined_call_operand.vmem [shape: f32[1,128], index: 7, kind: input, shape index: {}]   ;;  %s4155_s8 = inlined_call_operand.vmem [shape: f32[1,128], index: 8, kind: input, shape index: {}]   ;;  %s4156_s9 = inlined_call_operand.hbm [shape: bf16[128,512], index: 9, kind: input, shape index: {}]   ;;  %s4157_s10 = inlined_call_operand.vmem [shape: f32[1,512], index: 10, kind: input, shape index: {}]   ;;  %s4158_s11 = inlined_call_operand.hbm [shape: bf16[512,128], index: 11, kind: input, shape index: {}]   ;;  %s4159_s12 = inlined_call_operand.vmem [shape: f32[1,128], index: 12, kind: input, shape index: {}]   ;;  %s4160_s13 = inlined_call_operand.hbm [shape: f32[32,128], index: 13, kind: output, shape index: {}]  }
   0x1   :  { %19 = vsyncpa [#allocation7], 0 }
   0x2   :  { %20 = vsyncpa [#allocation10], 0 }
   0x3   :  { %21 = vsyncpa [#allocation13], 0 }
   0x4   :  { %22 = vsyncpa [#allocation5], 0  ;;  %s3406_s25 = smov [#allocation6]   ;;  %s3407_s27 = smov [#allocation9]  }
   0x5   :  { %s41_s26 = sshll.u32 %s3406_s25, 4  ;;  %s60_s28 = sshll.u32 %s3407_s27, 4  ;;  %s42_s26 = int_to_ptr.vmem [resolvable:$true] %s41_s26  ;;  %s3498_s28 = int_to_ptr.vmem [resolvable:$true] %s60_s28 }
   0x6   :  { %s3220_s14 = scalar_lea.hbm %s4148_s1, 16 }
   0x7   :  { %p3221_p0 = scmp.ne.s32.totalorder %s4148_s1, %s3220_s14  ;;  %p3224_p1 = scmp.lt.u32.totalorder %s3220_s14, %s4148_s1 }
   0x9   :  { %p3226_p2 = pnand %p3224_p1, %p3221_p0 }
   0xb   :  { %3229 = shalt.err (!%p3226_p2)
}
   0xc   :  { %s3230_s19 = scalar_lea.vmem %s42_s26, 16  ;;  %s3234_s20 = scalar_lea.vmem %s42_s26, 32 }
   0xd   :  { %p3231_p3 = scmp.ne.s32.totalorder %s42_s26, %s3230_s19  ;;  %p3235_p4 = scmp.lt.s32.totalorder %s42_s26, %s42_s26 }
   0xe   :  { %p3236_p5 = scmp.lt.s32.totalorder %s3234_s20, %s3230_s19 }
  0x10   :  { %p3237_p6 = por %p3236_p5, %p3235_p4 }
  0x12   :  { %p3238_p7 = pnand %p3237_p6, %p3231_p3 }
  0x14   :  { %3241 = shalt.err (!%p3238_p7)
}
  0x15   :  { %44 = dma.hbm_to_vmem [thread:$0]  %s4148_s1, 16, %s42_s26, [#allocation7]  }
  0x16   :  { %s3242_s25 = scalar_lea.hbm %s4150_s3, 3072 }
  0x17   :  { %p3243_p8 = scmp.ne.s32.totalorder %s4150_s3, %s3242_s25  ;;  %p3246_p9 = scmp.lt.u32.totalorder %s3242_s25, %s4150_s3 }
  0x19   :  { %p3248_p10 = pnand %p3246_p9, %p3243_p8 }
  0x1b   :  { %3251 = shalt.err (!%p3248_p10)
}
  0x1c   :  { %s3252_s15 = scalar_lea.vmem %s3498_s28, 3072  ;;  %p3257_p12 = scmp.lt.s32.totalorder %s3498_s28, %s3498_s28 }
  0x1d   :  { %p3253_p11 = scmp.ne.s32.totalorder %s3498_s28, %s3252_s15  ;;  %p3258_p13 = scmp.lt.s32.totalorder %s3252_s15, %s3252_s15 }
  0x1f   :  { %p3259_p0 = por %p3258_p13, %p3257_p12 }
  0x21   :  { %p3260_p1 = pnand %p3259_p0, %p3253_p11 }
  0x23   :  { %3263 = shalt.err (!%p3260_p1)
}
  0x24   :  { %s3408_s1 = smov 192   ;;  %s3409_s26 = smov 12  }
  0x25   :  { %66 = dma.hbm_to_vmem [thread:$0]  %s4150_s3, 3072, %s3498_s28, [#allocation10], %s3408_s1, %s3408_s1, %s3409_s26  }
  0x26   :  { %s3410_s18 = smov [#allocation12]   ;;  %s3264_s22 = scalar_lea.hbm %s4156_s9, 4096 }
  0x27   :  { %s92_s19 = sshll.u32 %s3410_s18, 4  ;;  %p3265_p2 = scmp.ne.s32.totalorder %s4156_s9, %s3264_s22  ;;  %s93_s19 = int_to_ptr.vmem [resolvable:$true] %s92_s19 }
  0x28   :  { %p3268_p3 = scmp.lt.u32.totalorder %s3264_s22, %s4156_s9 }
  0x2a   :  { %p3270_p4 = pnand %p3268_p3, %p3265_p2 }
  0x2c   :  { %3273 = shalt.err (!%p3270_p4)
}
  0x2d   :  { %s3274_s29 = scalar_lea.vmem %s93_s19, 4096  ;;  %p3279_p6 = scmp.lt.s32.totalorder %s93_s19, %s93_s19 }
  0x2e   :  { %p3275_p5 = scmp.ne.s32.totalorder %s93_s19, %s3274_s29  ;;  %p3280_p7 = scmp.lt.s32.totalorder %s3274_s29, %s3274_s29 }
  0x30   :  { %p3281_p8 = por %p3280_p7, %p3279_p6 }
  0x32   :  { %p3282_p9 = pnand %p3281_p8, %p3275_p5 }
  0x34   :  { %3285 = shalt.err (!%p3282_p9)
}
  0x35   :  { %s3411_s3 = smov 256   ;;  %s3412_s28 = smov 16  }
  0x36   :  { %98 = dma.hbm_to_vmem [thread:$0]  %s4156_s9, 4096, %s93_s19, [#allocation13], %s3411_s3, %s3411_s3, %s3412_s28  }
  0x37   :  { %s3413_s15 = smov [#allocation3]   ;;  %s3286_s17 = scalar_lea.hbm %s4147_s0, 512 }
  0x38   :  { %s28_s1 = sshll.u32 %s3413_s15, 4  ;;  %p3287_p10 = scmp.ne.s32.totalorder %s4147_s0, %s3286_s17  ;;  %s29_s1 = int_to_ptr.vmem [resolvable:$true] %s28_s1 }
  0x39   :  { %p3290_p11 = scmp.lt.u32.totalorder %s3286_s17, %s4147_s0 }
  0x3b   :  { %p3292_p12 = pnand %p3290_p11, %p3287_p10 }
  0x3d   :  { %3295 = shalt.err (!%p3292_p12)
}
  0x3e   :  { %s3296_s23 = scalar_lea.vmem %s29_s1, 512  ;;  %p3301_p0 = scmp.lt.s32.totalorder %s29_s1, %s29_s1 }
  0x3f   :  { %p3297_p13 = scmp.ne.s32.totalorder %s29_s1, %s3296_s23  ;;  %p3302_p1 = scmp.lt.s32.totalorder %s3296_s23, %s3296_s23 }
  0x41   :  { %p3303_p2 = por %p3302_p1, %p3301_p0 }
  0x43   :  { %p3304_p3 = pnand %p3303_p2, %p3297_p13 }
  0x45   :  { %3307 = shalt.err (!%p3304_p3)
}
  0x46   :  { %s3414_s9 = smov 128   ;;  %s3415_s19 = smov 8  }
  0x47   :  { %34 = dma.hbm_to_vmem [thread:$0]  %s4147_s0, 512, %s29_s1, [#allocation4], %s3414_s9, %s3414_s9, %s3415_s19  }
  0x48   :  { %s3416_s27 = smov [#allocation8]   ;;  %s3417_s3 = smov [#allocation11]  }
  0x49   :  { %s51_s29 = sshll.u32 %s3416_s27, 4  ;;  %s74_s28 = sshll.u32 %s3417_s3, 4  ;;  %s52_s29 = int_to_ptr.vmem [resolvable:$true] %s51_s29  ;;  %s3556_s28 = int_to_ptr.vmem [resolvable:$true] %s74_s28 }
  0x4a   :  { %s3308_s15 = scalar_lea.hbm %s4149_s2, 16 }
  0x4b   :  { %p3309_p4 = scmp.ne.s32.totalorder %s4149_s2, %s3308_s15  ;;  %p3312_p5 = scmp.lt.u32.totalorder %s3308_s15, %s4149_s2 }
  0x4d   :  { %p3314_p6 = pnand %p3312_p5, %p3309_p4 }
  0x4f   :  { %3317 = shalt.err (!%p3314_p6)
}
  0x50   :  { %s3318_s0 = scalar_lea.vmem %s52_s29, 16  ;;  %s3322_s1 = scalar_lea.vmem %s52_s29, 32 }
  0x51   :  { %p3319_p7 = scmp.ne.s32.totalorder %s52_s29, %s3318_s0  ;;  %p3323_p8 = scmp.lt.s32.totalorder %s52_s29, %s52_s29 }
  0x52   :  { %p3324_p9 = scmp.lt.s32.totalorder %s3322_s1, %s3318_s0 }
  0x54   :  { %p3325_p10 = por %p3324_p9, %p3323_p8 }
  0x56   :  { %p3326_p11 = pnand %p3325_p10, %p3319_p7 }
  0x58   :  { %3329 = shalt.err (!%p3326_p11)
}
  0x59   :  { %54 = dma.hbm_to_vmem [thread:$0]  %s4149_s2, 16, %s52_s29, [#allocation7]  }
  0x5a   :  { %s3330_s24 = scalar_lea.hbm %s4152_s5, 1024 }
  0x5b   :  { %p3331_p12 = scmp.ne.s32.totalorder %s4152_s5, %s3330_s24  ;;  %p3334_p13 = scmp.lt.u32.totalorder %s3330_s24, %s4152_s5 }
  0x5d   :  { %p3336_p0 = pnand %p3334_p13, %p3331_p12 }
  0x5f   :  { %3339 = shalt.err (!%p3336_p0)
}
  0x60   :  { %s3340_s14 = scalar_lea.vmem %s3556_s28, 1024  ;;  %p3345_p2 = scmp.lt.s32.totalorder %s3556_s28, %s3556_s28 }
  0x61   :  { %p3341_p1 = scmp.ne.s32.totalorder %s3556_s28, %s3340_s14  ;;  %p3346_p3 = scmp.lt.s32.totalorder %s3340_s14, %s3340_s14 }
  0x63   :  { %p3347_p4 = por %p3346_p3, %p3345_p2 }
  0x65   :  { %p3348_p5 = pnand %p3347_p4, %p3341_p1 }
  0x67   :  { %3351 = shalt.err (!%p3348_p5)
}
  0x68   :  { %s3418_s2 = smov 64   ;;  %s3419_s29 = smov 4  }
  0x69   :  { %80 = dma.hbm_to_vmem [thread:$0]  %s4152_s5, 1024, %s3556_s28, [#allocation10], %s3418_s2, %s3418_s2, %s3419_s29  }
  0x6a   :  { %s3420_s16 = smov [#allocation14]   ;;  %s3352_s1 = scalar_lea.hbm %s4158_s11, 4096 }
  0x6b   :  { %s106_s17 = sshll.u32 %s3420_s16, 4  ;;  %p3353_p6 = scmp.ne.s32.totalorder %s4158_s11, %s3352_s1  ;;  %s107_s17 = int_to_ptr.vmem [resolvable:$true] %s106_s17 }
  0x6c   :  { %p3356_p7 = scmp.lt.u32.totalorder %s3352_s1, %s4158_s11 }
  0x6e   :  { %p3358_p8 = pnand %p3356_p7, %p3353_p6 }
  0x70   :  { %3361 = shalt.err (!%p3358_p8)
}
  0x71   :  { %s3362_s24 = scalar_lea.vmem %s107_s17, 4096  ;;  %p3367_p10 = scmp.lt.s32.totalorder %s107_s17, %s107_s17 }
  0x72   :  { %p3363_p9 = scmp.ne.s32.totalorder %s107_s17, %s3362_s24  ;;  %p3368_p11 = scmp.lt.s32.totalorder %s3362_s24, %s3362_s24 }
  0x74   :  { %p3369_p12 = por %p3368_p11, %p3367_p10 }
  0x76   :  { %p3370_p13 = pnand %p3369_p12, %p3363_p9 }
  0x78   :  { %3373 = shalt.err (!%p3370_p13)
}
  0x79   :  { %112 = dma.hbm_to_vmem [thread:$0]  %s4158_s11, 4096, %s107_s17, [#allocation13], %s3418_s2, %s3418_s2, %s3419_s29  }
  0x7a   :  { %3396 = dma.done.wait [#allocation4], 512  }
  0x7b   :  { %3397 = vsyncadd [#allocation4], 4294966784 }
  0x7c   :  { %3398 = dma.done.wait [#allocation7], 32  }
  0x7d   :  { %3399 = vsyncadd [#allocation7], 4294967264 }
  0x7e   :  { %3400 = dma.done.wait [#allocation10], 4096  }
  0x7f   :  { %3401 = vsyncadd [#allocation10], 4294963200 }
  0x80   :  { %3402 = dma.done.wait [#allocation13], 8192  }
  0x81   :  { %3403 = vsyncadd [#allocation13], 4294959104  ;;  %v137_v0 = vld [vmem:[#allocation3] sm:$0xff]  ;;  %v139_v1 = vld [vmem:[#allocation3 + $0x10] sm:$0xff]  ;;  %v3421_v39 = vmov 0   ;;  %vm3423_vm0 = vmmov 0  }
  0x82   :  { %v138_v2 = vld [vmem:[#allocation3 + $0x8] sm:$0xff]  ;;  %152 = vadd.xlane.f32.xlu0 %v137_v0  ;;  %156 = vadd.xlane.f32.xlu1 %v139_v1  ;;  %v140_v3 = vld [vmem:[#allocation3 + $0x18] sm:$0xff]  ;;  %v2986_v5 = vld [vmem:[#allocation9] ss:$12 sps:$4 sm:$0xff]   ;;  %vm508_vm1 = vcmask 261120   ;;  %s3425_s27 = smov 32  }
  0x83   :  { %v2984_v4 = vld [vmem:[#allocation9 + $0x4] ss:$12 sps:$4 sm:$0xff]   ;;  %v2987_v6 = vld [vmem:[#allocation9 + $0x1c] ss:$12 sps:$4 sm:$0xff]   ;;  %v2991_v25 = vld [vmem:[#allocation9 + $0x34] ss:$12 sps:$4 sm:$0xff]   ;;  %428 = vmatprep.mubr.bf16.mxu0 %v3421_v39 }
  0x84   :  { %v2989_v7 = vld [vmem:[#allocation9 + $0x8] ss:$12 sps:$4 sm:$0xff]   ;;  %396 = vmatprep.subr.bf16.mxu0 %v2984_v4  ;;  %v2990_v24 = vld [vmem:[#allocation9 + $0x18] ss:$12 sps:$4 sm:$0xff]   ;;  %v2993_v26 = vld [vmem:[#allocation9 + $0x20] ss:$12 sps:$4 sm:$0xff]  }
  0x85   :  { %397 = vmatpush1.bf16.msra.mxu0 %v2986_v5  ;;  %2826 = vmatprep.subr.bf16.mxu1 %v2989_v7  ;;  %v2994_v27 = vld [vmem:[#allocation9 + $0x30] ss:$12 sps:$4 sm:$0xff]   ;;  %v2995_v28 = vld [vmem:[#allocation9 + $0x4c] ss:$12 sps:$4 sm:$0xff]   ;;  %v2998_v30 = vld [vmem:[#allocation9 + $0x48] ss:$12 sps:$4 sm:$0xff]  }
  0x86   :  { %154 = vadd.xlane.f32.xlu0 %v138_v2  ;;  %158 = vadd.xlane.f32.xlu1 %v140_v3  ;;  %v2997_v29 = vld [vmem:[#allocation9 + $0x38] ss:$12 sps:$4 sm:$0xff]   ;;  %v3001_v32 = vld [vmem:[#allocation9 + $0x50] ss:$12 sps:$4 sm:$0xff]   ;;  %v3002_v33 = vld [vmem:[#allocation9 + $0x60] ss:$12 sps:$4 sm:$0xff]  }
  0x87   :  { %398 = vmatprep.subr.bf16.mxu0 %v2987_v6  ;;  %2827 = vmatpush3.bf16.msra.mxu1 %v2989_v7  ;;  %v2999_v31 = vld [vmem:[#allocation9 + $0x64] ss:$12 sps:$4 sm:$0xff]   ;;  %v3003_v34 = vld [vmem:[#allocation9 + $0x7c] ss:$12 sps:$4 sm:$0xff]   ;;  %v3007_v37 = vld [vmem:[#allocation9 + $0x94] ss:$12 sps:$4 sm:$0xff]  }
  0x88   :  { %2828 = vmatprep.subr.bf16.mxu1 %v2993_v26  ;;  %v3005_v35 = vld [vmem:[#allocation9 + $0x68] ss:$12 sps:$4 sm:$0xff]   ;;  %v3006_v36 = vld [vmem:[#allocation9 + $0x78] ss:$12 sps:$4 sm:$0xff]   ;;  %v3009_v38 = vld [vmem:[#allocation9 + $0x80] ss:$12 sps:$4 sm:$0xff]  }
  0x89   :  { %399 = vmatpush1.bf16.msra.mxu0 %v2990_v24  ;;  %v3010_v40 = vld [vmem:[#allocation9 + $0x90] ss:$12 sps:$4 sm:$0xff]   ;;  %v3011_v41 = vld [vmem:[#allocation9 + $0xac] ss:$12 sps:$4 sm:$0xff]   ;;  %v3014_v43 = vld [vmem:[#allocation9 + $0xa8] ss:$12 sps:$4 sm:$0xff]  }
  0x8a   :  { %400 = vmatprep.subr.bf16.mxu0 %v2991_v25  ;;  %v3013_v42 = vld [vmem:[#allocation9 + $0x98] ss:$12 sps:$4 sm:$0xff]   ;;  %v3015_v44 = vld [vmem:[#allocation9 + $0xb0] ss:$12 sps:$4 sm:$0xff]   ;;  %vm556_vm4 = vcmask 130048   ;;  %vm758_vm5 = vcmask 523520  }
  0x8b   :  { %2829 = vmatpush3.bf16.msra.mxu1 %v2993_v26  ;;  %v2600_v59 = vld [vmem:[#allocation6] ss:$0 sm:$0xff]  ;;  %vm890_vm6 = vcmask 785920   ;;  %vm1022_vm7 = vcmask 1048320  }
  0x8c   :  { %2830 = vmatprep.subr.bf16.mxu1 %v2997_v29 }
  0x8d   :  { %401 = vmatpush1.bf16.msra.mxu0 %v2994_v27 }
  0x8e   :  { %402 = vmatprep.subr.bf16.mxu0 %v2995_v28 }
  0x8f   :  { %2831 = vmatpush3.bf16.msra.mxu1 %v2997_v29 }
  0x90   :  { %2832 = vmatprep.subr.bf16.mxu1 %v3001_v32 }
  0x91   :  { %403 = vmatpush1.bf16.msra.mxu0 %v2998_v30 }
  0x92   :  { %404 = vmatprep.subr.bf16.mxu0 %v2999_v31 }
  0x93   :  { %2833 = vmatpush3.bf16.msra.mxu1 %v3001_v32 }
  0x94   :  { %2834 = vmatprep.subr.bf16.mxu1 %v3005_v35 }
  0x95   :  { %405 = vmatpush1.bf16.msra.mxu0 %v3002_v33 }
  0x96   :  { %406 = vmatprep.subr.bf16.mxu0 %v3003_v34 }
  0x97   :  { %2835 = vmatpush3.bf16.msra.mxu1 %v3005_v35 }
  0x98   :  { %2836 = vmatprep.subr.bf16.mxu1 %v3009_v38 }
  0x99   :  { %407 = vmatpush1.bf16.msra.mxu0 %v3006_v36 }
  0x9a   :  { %408 = vmatprep.subr.bf16.mxu0 %v3007_v37 }
  0x9b   :  { %2837 = vmatpush3.bf16.msra.mxu1 %v3009_v38 }
  0x9c   :  { %2838 = vmatprep.subr.bf16.mxu1 %v3013_v42 }
  0x9d   :  { %409 = vmatpush1.bf16.msra.mxu0 %v3010_v40 }
  0x9e   :  { %410 = vmatprep.subr.bf16.mxu0 %v3011_v41 }
  0x9f   :  { %2839 = vmatpush3.bf16.msra.mxu1 %v3013_v42 }
  0xa0   :  { %2840 = vmatprep.subr.bf16.mxu1 %v3015_v44 }
  0xa1   :  { %411 = vmatpush1.bf16.msra.mxu0 %v3014_v43 }
  0xa3   :  { %2841 = vmatpush3.bf16.msra.mxu1 %v3015_v44 }
 0x10f   :  { %v153_v8 = vpop.xlane.xlu0 %152  ;;  %v157_v9 = vpop.xlane.xlu1 %156 }
 0x110   :  { %v161_v10 = vmul.f32 0.0078125, %v153_v8  ;;  %v163_v11 = vmul.f32 0.0078125, %v157_v9 }
 0x112   :  { %v3603_v12 = vsub.f32 %v137_v0, %v161_v10  ;;  %v3605_v13 = vsub.f32 %v139_v1, %v163_v11  ;;  %v2601_v0 = vld [vmem:[#allocation8] ss:$0 sm:$0xff] }
 0x113   :  { %v155_v14 = vpop.xlane.xlu0 %154  ;;  %v159_v15 = vpop.xlane.xlu1 %158 }
 0x114   :  { %v162_v16 = vmul.f32 0.0078125, %v155_v14  ;;  %v169_v17 = vmul.f32 %v3603_v12, %v3603_v12  ;;  %v164_v18 = vmul.f32 0.0078125, %v159_v15  ;;  %v171_v21 = vmul.f32 %v3605_v13, %v3605_v13 }
 0x115   :  { %v3422_v14 = vmov 0.0  }
 0x116   :  { %v3609_v19 = vsub.f32 %v138_v2, %v162_v16  ;;  %173 = vadd.xlane.f32.xlu0 %v169_v17  ;;  %v3611_v20 = vsub.f32 %v140_v3, %v164_v18  ;;  %2846 = vmatprep.subr.bf16.mxu0 %v3422_v14  ;;  %v251_v17 = vld [vmem:[%s4151_s4] sm:$0x7]  ;;  %s3424_s4 = smov 96  }
 0x117   :  { %2858 = vmatprep.subr.bf16.mxu1 %v3422_v14 }
 0x118   :  { %v170_v22 = vmul.f32 %v3609_v19, %v3609_v19  ;;  %v172_v23 = vmul.f32 %v3611_v20, %v3611_v20 }
 0x11a   :  { %177 = vadd.xlane.f32.xlu0 %v171_v21  ;;  %175 = vadd.xlane.f32.xlu1 %v170_v22 }
 0x11e   :  { %179 = vadd.xlane.f32.xlu1 %v172_v23 }
 0x1a3   :  { %v174_v45 = vpop.xlane.xlu0 %173 }
 0x1a4   :  { %v181_v46 = vmul.f32 0.0078125, %v174_v45 }
 0x1a6   :  { %v185_v47 = vadd.f32 1e-05, %v181_v46 }
 0x1a7   :  { %v176_v48 = vpop.xlane.xlu1 %175  ;;  %v178_v49 = vpop.xlane.xlu0 %177 }
 0x1a8   :  { %3104 = vrsqrt.f32 %v185_v47  ;;  %v182_v50 = vmul.f32 0.0078125, %v176_v48  ;;  %v183_v51 = vmul.f32 0.0078125, %v178_v49 }
 0x1aa   :  { %v186_v52 = vadd.f32 1e-05, %v182_v50  ;;  %v187_v53 = vadd.f32 1e-05, %v183_v51 }
 0x1ab   :  { %v180_v54 = vpop.xlane.xlu1 %179 }
 0x1ac   :  { %3106 = vrsqrt.f32 %v186_v52  ;;  %v184_v55 = vmul.f32 0.0078125, %v180_v54 }
 0x1ad   :  { %3108 = vrsqrt.f32 %v187_v53 }
 0x1ae   :  { %v188_v56 = vadd.f32 1e-05, %v184_v55 }
 0x1b0   :  { %3110 = vrsqrt.f32 %v188_v56 }
 0x1b2   :  { %v3105_v57 = vpop.eup %3104 }
 0x1b3   :  { %v193_v58 = vmul.f32 %v3105_v57, %v3603_v12 }
 0x1b5   :  { %v203_v63 = vmul.f32 %v2600_v59, %v193_v58 }
 0x1b6   :  { %v3107_v60 = vpop.eup %3106 }
 0x1b7   :  { %v3109_v61 = vpop.eup %3108  ;;  %v194_v62 = vmul.f32 %v3107_v60, %v3609_v19  ;;  %v213_v4 = vadd.f32 %v2601_v0, %v203_v63 }
 0x1b8   :  { %v195_v1 = vmul.f32 %v3109_v61, %v3605_v13  ;;  %v141_v13 = vlaneseq }
 0x1b9   :  { %v204_v2 = vmul.f32 %v2600_v59, %v194_v62 }
 0x1ba   :  { %v3111_v3 = vpop.eup %3110  ;;  %v205_v7 = vmul.f32 %v2600_v59, %v195_v1  ;;  %v3632_v15 = vshrl.u32 %v141_v13, 7 }
 0x1bb   :  { %v214_v5 = vadd.f32 %v2601_v0, %v204_v2  ;;  %v196_v6 = vmul.f32 %v3111_v3, %v3611_v20 }
 0x1bc   :  { %v215_v10 = vadd.f32 %v2601_v0, %v205_v7  ;;  %v255_v16 = vsub.s32 0, %v3632_v15  ;;  %v259_v18 = vsub.s32 1, %v3632_v15  ;;  %v263_v20 = vsub.s32 2, %v3632_v15 }
 0x1bd   :  { %v217_v8 = vpack.c.bf16 %v214_v5, %v213_v4  ;;  %v206_v9 = vmul.f32 %v2600_v59, %v196_v6 }
 0x1be   :  { %v256_v19 = vrot.slane %v251_v17, %v255_v16  ;;  %v260_v22 = vrot.slane %v251_v17, %v259_v18  ;;  %v264_v25 = vrot.slane %v251_v17, %v263_v20 }
 0x1bf   :  { %429 = vmatmul.mubr.bf16.vlgmr.msra.gmra.mrb[0].mxu0 %v217_v8  ;;  %2842 = vmatprep.mubr.bf16.mxu1 %v217_v8  ;;  %v216_v11 = vadd.f32 %v2601_v0, %v206_v9 }
 0x1c0   :  { %438 = vmatprep.mubr.bf16.mxu0 %v3421_v39 }
 0x1c1   :  { %v218_v12 = vpack.c.bf16 %v216_v11, %v215_v10 }
 0x1c3   :  { %2843 = vmatmul.mubr.bf16.vlgmr.msra.gmra.mrb[0].mxu1 %v218_v12 }
 0x1c4   :  { %2860 = vmatprep.mubr.msk.bf16.mxu1 %vm3423_vm0, %v3422_v14 }
 0x1c7   :  { %439 = vmatmul.mubr.bf16.gmra.mrb[4].mxu0 %v218_v12 }
 0x1c8   :  { %2848 = vmatprep.mubr.msk.bf16.mxu0 %vm3423_vm0, %v3422_v14 }
 0x292   :  { %v430_v21 = vpop.f32.mrb[0].mxu0 }
 0x293   :  { %v431_v23 = vadd.f32 %v430_v21, %v256_v19  ;;  %v432_v24 = vpop.f32.mrb[1].mxu0  ;;  %v143_v21 = vadd.s32 8, %v3632_v15 }
 0x294   :  { %v434_v26 = vpop.f32.mrb[2].mxu0  ;;  %v433_v29 = vadd.f32 %v432_v24, %v260_v22 }
 0x295   :  { %v435_v27 = vadd.f32 %v434_v26, %v256_v19  ;;  %v436_v28 = vpop.f32.mrb[3].mxu0  ;;  %v498_v32 = vmul.f32 0.17677669, %v431_v23 }
 0x296   :  { %v437_v30 = vadd.f32 %v436_v28, %v260_v22  ;;  %v2844_v31 = vpop.f32.mrb[0].mxu1 }
 0x297   :  { %v499_v33 = vmul.f32 0.17677669, %v435_v27  ;;  %v492_v34 = vadd.f32 %v2844_v31, %v264_v25  ;;  %v483_v35 = vpop.f32.mrb[1].mxu1 }
 0x298   :  { %v504_v36 = vpack.c.bf16 %v437_v30, %v433_v29  ;;  %v2845_v37 = vpop.f32.mrb[2].mxu1  ;;  %v484_v42 = vadd.f32 %v483_v35, %v264_v25 }
 0x299   :  { %v502_v38 = vpack.c.bf16 %v499_v33, %v498_v32  ;;  %v495_v40 = vadd.f32 %v2845_v37, %v264_v25  ;;  %v486_v41 = vpop.f32.mrb[3].mxu1 }
 0x29a   :  { %v487_v43 = vadd.f32 %v486_v41, %v264_v25  ;;  %630 = vrot.lane.b32.xlu0 %v504_v36, %s3424_s4  ;;  %v440_v44 = vpop.f32.mrb[4].mxu0  ;;  %v513_v45 = vsel %vm508_vm1, %v504_v36, 0 }
 0x29b   :  { %v3648_v46 = vpack.c.bf16 %v495_v40, %v492_v34  ;;  %v441_v47 = vadd.f32 %v440_v44, %v256_v19  ;;  %2847 = vmatpush3.bf16.xpose.msra.mxu0 %v513_v45  ;;  %627 = vrot.lane.b32.xlu1 %v502_v38, %s3424_s4  ;;  %v442_v48 = vpop.f32.mrb[5].mxu0 }
 0x29c   :  { %v3651_v49 = vpack.c.bf16 %v487_v43, %v484_v42  ;;  %v444_v50 = vpop.f32.mrb[6].mxu0  ;;  %2852 = vmatprep.subr.bf16.mxu0 %v3422_v14  ;;  %v443_v53 = vadd.f32 %v442_v48, %v260_v22 }
 0x29d   :  { %v445_v51 = vadd.f32 %v444_v50, %v256_v19  ;;  %v446_v52 = vpop.f32.mrb[7].mxu0  ;;  %v500_v55 = vmul.f32 0.17677669, %v441_v47  ;;  %v145_v19 = vand.u32 127, %v141_v13 }
 0x29e   :  { %v447_v54 = vadd.f32 %v446_v52, %v260_v22  ;;  %895 = vrot.lane.b32.xlu0 %v504_v36, %s3425_s27  ;;  %v3426_v22 = vmov -1e+30  }
 0x29f   :  { %v501_v56 = vmul.f32 0.17677669, %v445_v51  ;;  %763 = vrot.lane.b32.xlu1 %v504_v36, %s3418_s2  ;;  %vm146_vm2 = vcmp.le.s32.totalorder %v145_v19, %v3632_v15  ;;  %vm147_vm3 = vcmp.le.s32.totalorder %v145_v19, %v143_v21 }
 0x2a0   :  { %v505_v57 = vpack.c.bf16 %v447_v54, %v443_v53  ;;  %v3704_v23 = vsel %vm146_vm2, 0.0, %v3426_v22  ;;  %v3706_v25 = vsel %vm147_vm3, 0.0, %v3426_v22 }
 0x2a1   :  { %v503_v58 = vpack.c.bf16 %v501_v56, %v500_v55 }
 0x2a2   :  { %2849 = vmatmul.mubr.msk.bf16.vlgmr.msra.gmra.mrb[8].mxu0 %vm508_vm1, %v502_v38  ;;  %1145 = vrot.lane.b32.xlu0 %v505_v57, %s3424_s4  ;;  %v1029_v4 = vsel %vm508_vm1, %v505_v57, 0 }
 0x2a3   :  { %761 = vrot.lane.b32.xlu1 %v502_v38, %s3418_s2  ;;  %2853 = vmatpush3.bf16.msra.mxu0 %v3651_v49 }
 0x2a4   :  { %2854 = vmatprep.mubr.msk.bf16.mxu0 %vm3423_vm0, %v3422_v14  ;;  %2864 = vmatprep.subr.bf16.mxu0 %v3422_v14 }
 0x2a6   :  { %1277 = vrot.lane.b32.xlu0 %v505_v57, %s3418_s2 }
 0x2a7   :  { %893 = vrot.lane.b32.xlu1 %v502_v38, %s3425_s27 }
 0x2aa   :  { %1408 = vrot.lane.b32.xlu0 %v505_v57, %s3425_s27 }
 0x2ab   :  { %1142 = vrot.lane.b32.xlu1 %v503_v58, %s3424_s4 }
 0x2af   :  { %1275 = vrot.lane.b32.xlu1 %v503_v58, %s3418_s2 }
 0x2b3   :  { %1406 = vrot.lane.b32.xlu1 %v503_v58, %s3425_s27 }
 0x30c   :  { %v631_v59 = vpop.permute.xlu0 %630 }
 0x30d   :  { %v636_v60 = vsel %vm508_vm1, %v631_v59, 0  ;;  %v628_v61 = vpop.permute.xlu1 %627 }
 0x30e   :  { %2859 = vmatpush3.bf16.xpose.msra.mxu1 %v636_v60 }
 0x30f   :  { %2870 = vmatprep.subr.bf16.mxu1 %v3422_v14 }
 0x310   :  { %v896_v0 = vpop.permute.xlu0 %895 }
 0x311   :  { %v764_v62 = vpop.permute.xlu1 %763  ;;  %v901_v2 = vsel %vm508_vm1, %v896_v0, 0 }
 0x312   :  { %v769_v63 = vsel %vm508_vm1, %v764_v62, 0 }
 0x314   :  { %v1146_v5 = vpop.permute.xlu0 %1145 }
 0x315   :  { %2861 = vmatmul.mubr.msk.bf16.vlgmr.msra.gmra.mrb[4].mxu1 %vm508_vm1, %v628_v61  ;;  %v762_v1 = vpop.permute.xlu1 %761  ;;  %v1151_v6 = vsel %vm508_vm1, %v1146_v5, 0 }
 0x316   :  { %2871 = vmatpush3.bf16.xpose.msra.mxu1 %v769_v63  ;;  %2872 = vmatprep.mubr.msk.bf16.mxu1 %vm3423_vm0, %v3422_v14 }
 0x317   :  { %2882 = vmatprep.subr.bf16.mxu1 %v3422_v14 }
 0x318   :  { %v1278_v7 = vpop.permute.xlu0 %1277 }
 0x319   :  { %v894_v3 = vpop.permute.xlu1 %893  ;;  %v1283_v9 = vsel %vm508_vm1, %v1278_v7, 0 }
 0x31c   :  { %v1409_v10 = vpop.permute.xlu0 %1408 }
 0x31d   :  { %2873 = vmatmul.mubr.msk.bf16.vlgmr.msra.gmra.mrb[8].mxu1 %vm508_vm1, %v762_v1  ;;  %v1143_v8 = vpop.permute.xlu1 %1142  ;;  %v1414_v12 = vsel %vm508_vm1, %v1409_v10, 0 }
 0x31e   :  { %2883 = vmatpush3.bf16.xpose.msra.mxu1 %v901_v2  ;;  %2884 = vmatprep.mubr.msk.bf16.mxu1 %vm3423_vm0, %v3422_v14 }
 0x31f   :  { %2894 = vmatprep.subr.bf16.mxu1 %v3422_v14 }
 0x321   :  { %v1276_v11 = vpop.permute.xlu1 %1275 }
 0x325   :  { %2885 = vmatmul.mubr.msk.bf16.vlgmr.msra.gmra.mrb[12].mxu1 %vm508_vm1, %v894_v3  ;;  %v1407_v17 = vpop.permute.xlu1 %1406 }
 0x326   :  { %2895 = vmatpush3.bf16.xpose.msra.mxu1 %v1029_v4  ;;  %2896 = vmatprep.mubr.msk.bf16.mxu1 %vm3423_vm0, %v3422_v14 }
 0x327   :  { %2906 = vmatprep.subr.bf16.mxu1 %v3422_v14 }
 0x32d   :  { %2897 = vmatmul.mubr.msk.bf16.vlgmr.msra.gmra.mrb[16].mxu1 %vm508_vm1, %v503_v58 }
 0x32e   :  { %2907 = vmatpush3.bf16.xpose.msra.mxu1 %v1151_v6  ;;  %2908 = vmatprep.mubr.msk.bf16.mxu1 %vm3423_vm0, %v3422_v14 }
 0x32f   :  { %2918 = vmatprep.subr.bf16.mxu1 %v3422_v14 }
 0x335   :  { %2909 = vmatmul.mubr.msk.bf16.vlgmr.msra.gmra.mrb[20].mxu1 %vm508_vm1, %v1143_v8 }
 0x336   :  { %2919 = vmatpush3.bf16.xpose.msra.mxu1 %v1283_v9  ;;  %2920 = vmatprep.mubr.msk.bf16.mxu1 %vm3423_vm0, %v3422_v14 }
 0x337   :  { %2930 = vmatprep.subr.bf16.mxu1 %v3422_v14 }
 0x33d   :  { %2921 = vmatmul.mubr.msk.bf16.vlgmr.msra.gmra.mrb[24].mxu1 %vm508_vm1, %v1276_v11 }
 0x33e   :  { %2931 = vmatpush3.bf16.xpose.msra.mxu1 %v1414_v12  ;;  %2932 = vmatprep.mubr.msk.bf16.mxu1 %vm3423_vm0, %v3422_v14 }
 0x345   :  { %2933 = vmatmul.mubr.msk.bf16.vlgmr.msra.gmra.mrb[28].mxu1 %vm508_vm1, %v1407_v17 }
 0x375   :  { %v549_v24 = vpop.f32.mrb[8].mxu0 }
 0x376   :  { %v550_v26 = vadd.f32 %v549_v24, %v3704_v23  ;;  %v2850_v27 = vpop.f32.mrb[9].mxu0 }
 0x377   :  { %v552_v28 = vpop.f32.mrb[10].mxu0 }
 0x378   :  { %v553_v29 = vadd.f32 %v552_v28, %v3706_v25  ;;  %v2851_v30 = vpop.f32.mrb[11].mxu0  ;;  %v557_v13 = vsel %vm556_vm4, %v550_v26, -inf }
 0x379   :  { %558 = vmax.xlane.f32.xlu0 %v557_v13 }
 0x37a   :  { %v560_v31 = vsel %vm556_vm4, %v553_v29, -inf }
 0x37b   :  { %561 = vmax.xlane.f32.xlu1 %v560_v31 }
 0x3e8   :  { %v672_v32 = vpop.f32.mrb[4].mxu1 }
 0x3e9   :  { %v3713_v33 = vadd.f32 %v672_v32, %v3704_v23  ;;  %v2862_v34 = vpop.f32.mrb[5].mxu1 }
 0x3ea   :  { %v675_v35 = vpop.f32.mrb[6].mxu1 }
 0x3eb   :  { %v3716_v36 = vadd.f32 %v675_v35, %v3706_v25  ;;  %v2863_v37 = vpop.f32.mrb[7].mxu1  ;;  %v679_v38 = vsel %vm556_vm4, %v3713_v33, -inf }
 0x3ec   :  { %680 = vmax.xlane.f32.xlu0 %v679_v38 }
 0x3ed   :  { %v682_v40 = vsel %vm556_vm4, %v3716_v36, -inf }
 0x3f0   :  { %683 = vmax.xlane.f32.xlu0 %v682_v40  ;;  %v805_v41 = vpop.f32.mrb[8].mxu1 }
 0x3f1   :  { %v3723_v42 = vadd.f32 %v805_v41, %v3704_v23  ;;  %v2874_v43 = vpop.f32.mrb[9].mxu1 }
 0x3f2   :  { %v808_v44 = vpop.f32.mrb[10].mxu1 }
 0x3f3   :  { %v3726_v45 = vadd.f32 %v808_v44, %v3706_v25  ;;  %v2875_v47 = vpop.f32.mrb[11].mxu1  ;;  %v812_v48 = vsel %vm556_vm4, %v3723_v42, -inf }
 0x3f4   :  { %813 = vmax.xlane.f32.xlu0 %v812_v48 }
 0x3f5   :  { %v815_v50 = vsel %vm556_vm4, %v3726_v45, -inf }
 0x3f6   :  { %816 = vmax.xlane.f32.xlu1 %v815_v50 }
 0x3f8   :  { %v937_v51 = vpop.f32.mrb[12].mxu1 }
 0x3f9   :  { %v3733_v52 = vadd.f32 %v937_v51, %v3704_v23  ;;  %v2886_v53 = vpop.f32.mrb[13].mxu1 }
 0x3fa   :  { %v940_v54 = vpop.f32.mrb[14].mxu1 }
 0x3fb   :  { %v3736_v55 = vadd.f32 %v940_v54, %v3706_v25  ;;  %v2887_v56 = vpop.f32.mrb[15].mxu1  ;;  %v944_v57 = vsel %vm556_vm4, %v3733_v52, -inf }
 0x3fc   :  { %945 = vmax.xlane.f32.xlu0 %v944_v57 }
 0x3fd   :  { %v947_v58 = vsel %vm556_vm4, %v3736_v55, -inf }
 0x3fe   :  { %948 = vmax.xlane.f32.xlu1 %v947_v58 }
 0x400   :  { %v1065_v59 = vpop.f32.mrb[16].mxu1 }
 0x401   :  { %v3743_v60 = vadd.f32 %v1065_v59, %v3704_v23  ;;  %v2898_v61 = vpop.f32.mrb[17].mxu1 }
 0x402   :  { %v1068_v62 = vpop.f32.mrb[18].mxu1 }
 0x403   :  { %v3746_v63 = vadd.f32 %v1068_v62, %v3706_v25  ;;  %v2899_v0 = vpop.f32.mrb[19].mxu1  ;;  %v1072_v1 = vsel %vm556_vm4, %v3743_v60, -inf }
 0x404   :  { %1073 = vmax.xlane.f32.xlu0 %v1072_v1 }
 0x405   :  { %v1075_v2 = vsel %vm556_vm4, %v3746_v63, -inf }
 0x406   :  { %1076 = vmax.xlane.f32.xlu1 %v1075_v2  ;;  %v559_v3 = vpop.xlane.xlu0 %558 }
 0x407   :  { %v563_v4 = vsub.f32 %v550_v26, %v559_v3 }
 0x408   :  { %v562_v5 = vpop.xlane.xlu1 %561  ;;  %v1187_v6 = vpop.f32.mrb[20].mxu1 }
 0x409   :  { %v565_v7 = vmul.f32 1.442695, %v563_v4  ;;  %v564_v8 = vsub.f32 %v553_v29, %v562_v5  ;;  %v3753_v9 = vadd.f32 %v1187_v6, %v3704_v23  ;;  %v2910_v10 = vpop.f32.mrb[21].mxu1 }
 0x40a   :  { %v1190_v11 = vpop.f32.mrb[22].mxu1 }
 0x40b   :  { %3112 = vpow2.f32 %v565_v7  ;;  %v567_v12 = vmul.f32 1.442695, %v564_v8  ;;  %v3756_v17 = vadd.f32 %v1190_v11, %v3706_v25  ;;  %v2911_v19 = vpop.f32.mrb[23].mxu1  ;;  %v1194_v21 = vsel %vm556_vm4, %v3753_v9, -inf }
 0x40c   :  { %1195 = vmax.xlane.f32.xlu0 %v1194_v21 }
 0x40d   :  { %3114 = vpow2.f32 %v567_v12  ;;  %v1197_v22 = vsel %vm556_vm4, %v3756_v17, -inf }
 0x40e   :  { %1198 = vmax.xlane.f32.xlu1 %v1197_v22 }
 0x410   :  { %v1319_v24 = vpop.f32.mrb[24].mxu1 }
 0x411   :  { %v3763_v26 = vadd.f32 %v1319_v24, %v3704_v23  ;;  %v2922_v27 = vpop.f32.mrb[25].mxu1 }
 0x412   :  { %v1322_v28 = vpop.f32.mrb[26].mxu1 }
 0x413   :  { %v3766_v29 = vadd.f32 %v1322_v28, %v3706_v25  ;;  %v2923_v30 = vpop.f32.mrb[27].mxu1  ;;  %v1326_v13 = vsel %vm556_vm4, %v3763_v26, -inf }
 0x414   :  { %1327 = vmax.xlane.f32.xlu0 %v1326_v13 }
 0x415   :  { %v3770_v31 = vpop.eup %3112  ;;  %v1329_v32 = vsel %vm556_vm4, %v3766_v29, -inf }
 0x416   :  { %1330 = vmax.xlane.f32.xlu1 %v1329_v32  ;;  %v569_v34 = vsel %vm556_vm4, %v3770_v31, 0.0 }
 0x417   :  { %v3776_v35 = vpop.eup %3114 }
 0x418   :  { %v1450_v37 = vpop.f32.mrb[28].mxu1  ;;  %570 = vadd.xlane.f32.xlu0 %v569_v34  ;;  %v572_v38 = vsel %vm556_vm4, %v3776_v35, 0.0 }
 0x419   :  { %v3781_v40 = vadd.f32 %v1450_v37, %v3704_v23  ;;  %v2934_v41 = vpop.f32.mrb[29].mxu1 }
 0x41a   :  { %573 = vadd.xlane.f32.xlu1 %v572_v38  ;;  %v1453_v43 = vpop.f32.mrb[30].mxu1 }
 0x41b   :  { %v3784_v44 = vadd.f32 %v1453_v43, %v3706_v25  ;;  %v2935_v47 = vpop.f32.mrb[31].mxu1  ;;  %v1457_v48 = vsel %vm556_vm4, %v3781_v40, -inf }
 0x41c   :  { %1458 = vmax.xlane.f32.xlu0 %v1457_v48 }
 0x41d   :  { %v1460_v50 = vsel %vm556_vm4, %v3784_v44, -inf }
 0x41e   :  { %1461 = vmax.xlane.f32.xlu1 %v1460_v50 }
 0x42f   :  { %835 = vrot.lane.b32.xlu1 %v3651_v49, %s3418_s2 }
 0x432   :  { %703 = vrot.lane.b32.xlu0 %v3651_v49, %s3424_s4 }
 0x479   :  { %v681_v23 = vpop.xlane.xlu0 %680 }
 0x47a   :  { %v685_v51 = vsub.f32 %v3713_v33, %v681_v23 }
 0x47c   :  { %v687_v25 = vmul.f32 1.442695, %v685_v51 }
 0x47d   :  { %v684_v53 = vpop.xlane.xlu0 %683 }
 0x47e   :  { %3116 = vpow2.f32 %v687_v25  ;;  %v686_v54 = vsub.f32 %v3716_v36, %v684_v53 }
 0x480   :  { %v689_v56 = vmul.f32 1.442695, %v686_v54 }
 0x481   :  { %v814_v57 = vpop.xlane.xlu0 %813 }
 0x482   :  { %3118 = vpow2.f32 %v689_v56  ;;  %v818_v58 = vsub.f32 %v3723_v42, %v814_v57 }
 0x483   :  { %v817_v59 = vpop.xlane.xlu1 %816 }
 0x484   :  { %v820_v61 = vmul.f32 1.442695, %v818_v58  ;;  %v819_v62 = vsub.f32 %v3726_v45, %v817_v59 }
 0x486   :  { %3120 = vpow2.f32 %v820_v61  ;;  %v822_v0 = vmul.f32 1.442695, %v819_v62 }
 0x488   :  { %v3798_v1 = vpop.eup %3116  ;;  %3122 = vpow2.f32 %v822_v0 }
 0x489   :  { %v946_v33 = vpop.xlane.xlu0 %945  ;;  %v691_v2 = vsel %vm556_vm4, %v3798_v1, 0.0 }
 0x48a   :  { %v950_v36 = vsub.f32 %v3733_v52, %v946_v33  ;;  %692 = vadd.xlane.f32.xlu0 %v691_v2 }
 0x48b   :  { %v949_v3 = vpop.xlane.xlu1 %948 }
 0x48c   :  { %v3803_v4 = vpop.eup %3118  ;;  %v952_v42 = vmul.f32 1.442695, %v950_v36  ;;  %v951_v5 = vsub.f32 %v3736_v55, %v949_v3 }
 0x48d   :  { %v694_v45 = vsel %vm556_vm4, %v3803_v4, 0.0 }
 0x48e   :  { %3124 = vpow2.f32 %v952_v42  ;;  %v954_v6 = vmul.f32 1.442695, %v951_v5  ;;  %695 = vadd.xlane.f32.xlu1 %v694_v45 }
 0x490   :  { %v3808_v7 = vpop.eup %3120  ;;  %3126 = vpow2.f32 %v954_v6 }
 0x491   :  { %v1074_v8 = vpop.xlane.xlu0 %1073  ;;  %v824_v52 = vsel %vm556_vm4, %v3808_v7, 0.0 }
 0x492   :  { %v3812_v10 = vpop.eup %3122  ;;  %v1078_v11 = vsub.f32 %v3743_v60, %v1074_v8  ;;  %825 = vadd.xlane.f32.xlu0 %v824_v52 }
 0x493   :  { %v1077_v12 = vpop.xlane.xlu1 %1076  ;;  %v827_v55 = vsel %vm556_vm4, %v3812_v10, 0.0 }
 0x494   :  { %v1080_v19 = vmul.f32 1.442695, %v1078_v11  ;;  %v1079_v21 = vsub.f32 %v3746_v63, %v1077_v12  ;;  %828 = vadd.xlane.f32.xlu1 %v827_v55 }
 0x496   :  { %3128 = vpow2.f32 %v1080_v19  ;;  %v1082_v22 = vmul.f32 1.442695, %v1079_v21 }
 0x498   :  { %v3818_v24 = vpop.eup %3124  ;;  %3130 = vpow2.f32 %v1082_v22 }
 0x499   :  { %v1196_v27 = vpop.xlane.xlu0 %1195  ;;  %v956_v28 = vsel %vm556_vm4, %v3818_v24, 0.0 }
 0x49a   :  { %v3822_v30 = vpop.eup %3126  ;;  %v1200_v60 = vsub.f32 %v3753_v9, %v1196_v27  ;;  %957 = vadd.xlane.f32.xlu0 %v956_v28 }
 0x49b   :  { %v1199_v13 = vpop.xlane.xlu1 %1198  ;;  %v959_v32 = vsel %vm556_vm4, %v3822_v30, 0.0 }
 0x49c   :  { %v1202_v63 = vmul.f32 1.442695, %v1200_v60  ;;  %v1201_v34 = vsub.f32 %v3756_v17, %v1199_v13  ;;  %960 = vadd.xlane.f32.xlu1 %v959_v32 }
 0x49e   :  { %3132 = vpow2.f32 %v1202_v63  ;;  %v1204_v37 = vmul.f32 1.442695, %v1201_v34 }
 0x4a0   :  { %v3828_v38 = vpop.eup %3128  ;;  %3134 = vpow2.f32 %v1204_v37 }
 0x4a1   :  { %v1328_v41 = vpop.xlane.xlu0 %1327  ;;  %v1084_v43 = vsel %vm556_vm4, %v3828_v38, 0.0 }
 0x4a2   :  { %v3832_v47 = vpop.eup %3130  ;;  %1085 = vadd.xlane.f32.xlu0 %v1084_v43  ;;  %v1332_v6 = vsub.f32 %v3763_v26, %v1328_v41 }
 0x4a3   :  { %v1331_v9 = vpop.xlane.xlu1 %1330  ;;  %v1087_v48 = vsel %vm556_vm4, %v3832_v47, 0.0 }
 0x4a4   :  { %v1333_v50 = vsub.f32 %v3766_v29, %v1331_v9  ;;  %1088 = vadd.xlane.f32.xlu1 %v1087_v48  ;;  %v1334_v8 = vmul.f32 1.442695, %v1332_v6 }
 0x4a5   :  { %v571_v17 = vpop.xlane.xlu0 %570 }
 0x4a6   :  { %v1336_v23 = vmul.f32 1.442695, %v1333_v50  ;;  %3136 = vrcp.f32 %v571_v17 }
 0x4a7   :  { %v574_v51 = vpop.xlane.xlu1 %573 }
 0x4a8   :  { %v3837_v25 = vpop.eup %3132  ;;  %3138 = vpow2.f32 %v1336_v23 }
 0x4a9   :  { %3140 = vrcp.f32 %v574_v51  ;;  %v1459_v53 = vpop.xlane.xlu0 %1458  ;;  %v1206_v54 = vsel %vm556_vm4, %v3837_v25, 0.0 }
 0x4aa   :  { %v3841_v56 = vpop.eup %3134  ;;  %v1463_v57 = vsub.f32 %v3781_v40, %v1459_v53  ;;  %1207 = vadd.xlane.f32.xlu1 %v1206_v54 }
 0x4ab   :  { %v1462_v58 = vpop.xlane.xlu1 %1461  ;;  %v1209_v61 = vsel %vm556_vm4, %v3841_v56, 0.0 }
 0x4ac   :  { %v1465_v29 = vmul.f32 1.442695, %v1463_v57  ;;  %v1464_v59 = vsub.f32 %v3784_v44, %v1462_v58 }
 0x4ad   :  { %v704_v5 = vpop.permute.xlu0 %703 }
 0x4ae   :  { %3142 = vpow2.f32 %v1465_v29  ;;  %v1467_v62 = vmul.f32 1.442695, %v1464_v59  ;;  %1210 = vadd.xlane.f32.xlu1 %v1209_v61 }
 0x4af   :  { %v836_v11 = vpop.permute.xlu1 %835 }
 0x4b0   :  { %3144 = vpow2.f32 %v1467_v62  ;;  %v3137_v0 = vpop.eup %3136 }
 0x4b1   :  { %v577_v40 = vmul.f32 %v3137_v0, %v3770_v31  ;;  %3146 = vpow2.f32 %v1334_v8 }
 0x4b2   :  { %v3847_v33 = vpop.eup %3138 }
 0x4b3   :  { %v3141_v2 = vpop.eup %3140  ;;  %v1341_v36 = vsel %vm556_vm4, %v3847_v33, 0.0 }
 0x4b4   :  { %v578_v3 = vmul.f32 %v3141_v2, %v3776_v35  ;;  %1342 = vadd.xlane.f32.xlu1 %v1341_v36 }
 0x4b6   :  { %v579_v44 = vpack.c.bf16 %v578_v3, %v577_v40 }
 0x4b8   :  { %v3853_v42 = vpop.eup %3142  ;;  %2855 = vmatmul.mubr.msk.bf16.vlgmr.msra.gmra.mrb[12].mxu0 %vm556_vm4, %v579_v44  ;;  %967 = vrot.lane.b32.xlu0 %v3651_v49, %s3425_s27 }
 0x4b9   :  { %2865 = vmatpush3.bf16.msra.mxu0 %v704_v5  ;;  %v1469_v45 = vsel %vm556_vm4, %v3853_v42, 0.0  ;;  %2866 = vmatprep.mubr.msk.bf16.mxu0 %vm3423_vm0, %v3422_v14 }
 0x4ba   :  { %v3862_v31 = vpop.eup %3144  ;;  %1470 = vadd.xlane.f32.xlu1 %v1469_v45  ;;  %2876 = vmatprep.subr.bf16.mxu0 %v3422_v14 }
 0x4bb   :  { %v1472_v35 = vsel %vm556_vm4, %v3862_v31, 0.0  ;;  %v3870_v49 = vpop.eup %3146 }
 0x4bc   :  { %v1338_v52 = vsel %vm556_vm4, %v3870_v49, 0.0 }
 0x4be   :  { %1473 = vadd.xlane.f32.xlu1 %v1472_v35 }
 0x4cf   :  { %1218 = vrot.lane.b32.xlu1 %v3648_v46, %s3424_s4 }
 0x4d7   :  { %1339 = vadd.xlane.f32.xlu0 %v1338_v52 }
 0x4ed   :  { %1349 = vrot.lane.b32.xlu0 %v3648_v46, %s3418_s2 }
 0x4f1   :  { %1480 = vrot.lane.b32.xlu0 %v3648_v46, %s3425_s27 }
 0x517   :  { %v693_v12 = vpop.xlane.xlu0 %692 }
 0x518   :  { %3148 = vrcp.f32 %v693_v12 }
 0x51b   :  { %v696_v26 = vpop.xlane.xlu1 %695 }
 0x51c   :  { %3150 = vrcp.f32 %v696_v26 }
 0x51f   :  { %v826_v55 = vpop.xlane.xlu0 %825 }
 0x520   :  { %3152 = vrcp.f32 %v826_v55 }
 0x521   :  { %v829_v19 = vpop.xlane.xlu1 %828 }
 0x522   :  { %3154 = vrcp.f32 %v829_v19  ;;  %v3149_v21 = vpop.eup %3148 }
 0x523   :  { %v699_v27 = vmul.f32 %v3149_v21, %v3798_v1 }
 0x526   :  { %v3151_v22 = vpop.eup %3150 }
 0x527   :  { %v700_v28 = vmul.f32 %v3151_v22, %v3803_v4  ;;  %v958_v60 = vpop.xlane.xlu0 %957 }
 0x528   :  { %3156 = vrcp.f32 %v958_v60 }
 0x529   :  { %v961_v13 = vpop.xlane.xlu1 %960  ;;  %v701_v32 = vpack.c.bf16 %v700_v28, %v699_v27 }
 0x52a   :  { %3158 = vrcp.f32 %v961_v13  ;;  %v3153_v63 = vpop.eup %3152 }
 0x52b   :  { %2867 = vmatmul.mubr.msk.bf16.vlgmr.msra.gmra.mrb[16].mxu0 %vm556_vm4, %v701_v32  ;;  %v832_v1 = vmul.f32 %v3153_v63, %v3808_v7 }
 0x52c   :  { %v3155_v34 = vpop.eup %3154  ;;  %2877 = vmatpush3.bf16.msra.mxu0 %v836_v11  ;;  %2878 = vmatprep.mubr.msk.bf16.mxu0 %vm3423_vm0, %v3422_v14 }
 0x52d   :  { %v833_v37 = vmul.f32 %v3155_v34, %v3812_v10  ;;  %2888 = vmatprep.subr.bf16.mxu0 %v3422_v14 }
 0x52f   :  { %v1086_v4 = vpop.xlane.xlu0 %1085  ;;  %v834_v43 = vpack.c.bf16 %v833_v37, %v832_v1  ;;  %v3016_v1 = vld [vmem:[#allocation11] sm:$0xff]  }
 0x530   :  { %3160 = vrcp.f32 %v1086_v4  ;;  %v3017_v4 = vld [vmem:[#allocation11 + $0x8] sm:$0xff]   ;;  %2942 = vmatprep.subr.bf16.mxu1 %v3016_v1 }
 0x531   :  { %v1089_v41 = vpop.xlane.xlu1 %1088  ;;  %2943 = vmatpush3.bf16.msra.mxu1 %v3016_v1  ;;  %v3032_v1 = vld [vmem:[#allocation12 + $0x24] ss:$16 sps:$4 sm:$0xff]  }
 0x532   :  { %3162 = vrcp.f32 %v1089_v41  ;;  %v3157_v9 = vpop.eup %3156  ;;  %2944 = vmatprep.subr.bf16.mxu1 %v3017_v4  ;;  %v3018_v41 = vld [vmem:[#allocation11 + $0x10] sm:$0xff]  }
 0x533   :  { %2879 = vmatmul.mubr.msk.bf16.vlgmr.msra.gmra.mrb[20].mxu0 %vm556_vm4, %v834_v43  ;;  %v968_v48 = vpop.permute.xlu0 %967  ;;  %v964_v7 = vmul.f32 %v3157_v9, %v3818_v24 }
 0x534   :  { %v3159_v50 = vpop.eup %3158  ;;  %2889 = vmatpush3.bf16.msra.mxu0 %v968_v48  ;;  %2890 = vmatprep.mubr.msk.bf16.mxu0 %vm3423_vm0, %v3422_v14 }
 0x535   :  { %v965_v10 = vmul.f32 %v3159_v50, %v3822_v30  ;;  %2900 = vmatprep.subr.bf16.mxu0 %v3422_v14  ;;  %2945 = vmatpush3.bf16.msra.mxu1 %v3017_v4  ;;  %v3035_v4 = vld [vmem:[#allocation12 + $0x2c] ss:$16 sps:$4 sm:$0xff]  }
 0x536   :  { %2946 = vmatprep.subr.bf16.mxu1 %v3018_v41 }
 0x537   :  { %v1208_v17 = vpop.xlane.xlu1 %1207  ;;  %v966_v23 = vpack.c.bf16 %v965_v10, %v964_v7  ;;  %v3019_v10 = vld [vmem:[#allocation11 + $0x18] sm:$0xff]   ;;  %v3020_v7 = vld [vmem:[#allocation11 + $0x20] sm:$0xff]  }
 0x539   :  { %2947 = vmatpush3.bf16.msra.mxu1 %v3018_v41  ;;  %v3030_v41 = vld [vmem:[#allocation12 + $0x20] ss:$16 sps:$4 sm:$0xff]  }
 0x53a   :  { %v3161_v51 = vpop.eup %3160  ;;  %2948 = vmatprep.subr.bf16.mxu1 %v3019_v10 }
 0x53b   :  { %2891 = vmatmul.mubr.msk.bf16.vlgmr.msra.gmra.mrb[24].mxu0 %vm556_vm4, %v966_v23  ;;  %v1211_v57 = vpop.xlane.xlu1 %1210  ;;  %v1092_v30 = vmul.f32 %v3161_v51, %v3828_v38  ;;  %v3022_v23 = vld [vmem:[#allocation11 + $0x30] sm:$0xff]  }
 0x53c   :  { %v3163_v53 = vpop.eup %3162  ;;  %2901 = vmatpush3.bf16.msra.mxu0 %v3648_v46  ;;  %2902 = vmatprep.mubr.msk.bf16.mxu0 %vm3423_vm0, %v3422_v14  ;;  %3164 = vrcp.f32 %v1211_v57 }
 0x53d   :  { %v1093_v54 = vmul.f32 %v3163_v53, %v3832_v47  ;;  %2912 = vmatprep.subr.bf16.mxu0 %v3422_v14  ;;  %3166 = vrcp.f32 %v1208_v17  ;;  %2949 = vmatpush3.bf16.msra.mxu1 %v3019_v10  ;;  %v3021_v17 = vld [vmem:[#allocation11 + $0x28] sm:$0xff]   ;;  %v3023_v53 = vld [vmem:[#allocation11 + $0x38] sm:$0xff]  }
 0x53e   :  { %2950 = vmatprep.subr.bf16.mxu1 %v3020_v7 }
 0x53f   :  { %v1094_v24 = vpack.c.bf16 %v1093_v54, %v1092_v30 }
 0x541   :  { %v1343_v58 = vpop.xlane.xlu1 %1342  ;;  %2951 = vmatpush3.bf16.msra.mxu1 %v3020_v7 }
 0x542   :  { %3168 = vrcp.f32 %v1343_v58  ;;  %2952 = vmatprep.subr.bf16.mxu1 %v3021_v17 }
 0x543   :  { %2903 = vmatmul.mubr.msk.bf16.vlgmr.msra.gmra.mrb[28].mxu0 %vm556_vm4, %v1094_v24 }
 0x544   :  { %2914 = vmatprep.mubr.msk.bf16.mxu0 %vm3423_vm0, %v3422_v14 }
 0x545   :  { %2953 = vmatpush3.bf16.msra.mxu1 %v3021_v17 }
 0x546   :  { %v3165_v29 = vpop.eup %3164  ;;  %2954 = vmatprep.subr.bf16.mxu1 %v3022_v23 }
 0x547   :  { %v1471_v46 = vpop.xlane.xlu1 %1470  ;;  %v3167_v61 = vpop.eup %3166  ;;  %v1215_v47 = vmul.f32 %v3165_v29, %v3841_v56 }
 0x548   :  { %v1214_v62 = vmul.f32 %v3167_v61, %v3837_v25 }
 0x549   :  { %2955 = vmatpush3.bf16.msra.mxu1 %v3022_v23 }
 0x54a   :  { %v1216_v38 = vpack.c.bf16 %v1215_v47, %v1214_v62  ;;  %2956 = vmatprep.subr.bf16.mxu1 %v3023_v53 }
 0x54b   :  { %v1474_v59 = vpop.xlane.xlu1 %1473 }
 0x54c   :  { %v3169_v25 = vpop.eup %3168 }
 0x54d   :  { %v1347_v40 = vmul.f32 %v3169_v25, %v3847_v33  ;;  %2957 = vmatpush3.bf16.msra.mxu1 %v3023_v53 }
 0x54f   :  { %v1219_v0 = vpop.permute.xlu1 %1218 }
 0x550   :  { %2913 = vmatpush3.bf16.msra.mxu0 %v1219_v0 }
 0x551   :  { %2924 = vmatprep.subr.bf16.mxu0 %v3422_v14 }
 0x553   :  { %2915 = vmatmul.mubr.msk.bf16.vlgmr.msra.gmra.mrb[32].mxu0 %vm556_vm4, %v1216_v38 }
 0x554   :  { %2926 = vmatprep.mubr.msk.bf16.mxu0 %vm3423_vm0, %v3422_v14 }
 0x564   :  { %v1340_v2 = vpop.xlane.xlu0 %1339 }
 0x565   :  { %3170 = vrcp.f32 %v1340_v2 }
 0x566   :  { %3172 = vrcp.f32 %v1474_v59 }
 0x567   :  { %3174 = vrcp.f32 %v1471_v46 }
 0x568   :  { %v1350_v36 = vpop.permute.xlu0 %1349 }
 0x569   :  { %2925 = vmatpush3.bf16.msra.mxu0 %v1350_v36 }
 0x56a   :  { %2936 = vmatprep.subr.bf16.mxu0 %v3422_v14 }
 0x56c   :  { %v1481_v45 = vpop.permute.xlu0 %1480 }
 0x56f   :  { %v3171_v56 = vpop.eup %3170 }
 0x570   :  { %v1346_v3 = vmul.f32 %v3171_v56, %v3870_v49  ;;  %v3173_v5 = vpop.eup %3172 }
 0x571   :  { %v3175_v35 = vpop.eup %3174  ;;  %v1478_v6 = vmul.f32 %v3173_v5, %v3862_v31 }
 0x572   :  { %v1348_v44 = vpack.c.bf16 %v1347_v40, %v1346_v3  ;;  %v1477_v8 = vmul.f32 %v3175_v35, %v3853_v42 }
 0x574   :  { %2927 = vmatmul.mubr.msk.bf16.vlgmr.msra.gmra.mrb[36].mxu0 %vm556_vm4, %v1348_v44  ;;  %v1479_v52 = vpack.c.bf16 %v1478_v6, %v1477_v8 }
 0x575   :  { %2937 = vmatpush3.bf16.msra.mxu0 %v1481_v45  ;;  %2938 = vmatprep.mubr.msk.bf16.mxu0 %vm3423_vm0, %v3422_v14 }
 0x57c   :  { %2939 = vmatmul.mubr.msk.bf16.vlgmr.msra.gmra.mrb[40].mxu0 %vm556_vm4, %v1479_v52  ;;  %v2642_v52 = vld [vmem:[%s4153_s6] ss:$0 sm:$0xff] }
 0x57d   :  { %1981 = vmatprep.mubr.bf16.mxu0 %v3421_v39 }
 0x58b   :  { %v617_v33 = vpop.f32.mrb[12].mxu0 }
 0x58c   :  { %624 = vst.msk [vmem:[#allocation2] sm:$0xff] %vm508_vm1, %v617_v33  ;;  %v2856_v49 = vpop.f32.mrb[13].mxu0 }
 0x58d   :  { %v620_v11 = vpop.f32.mrb[14].mxu0 }
 0x58e   :  { %625 = vst.msk [vmem:[#allocation2 + $0x8] sm:$0xff] %vm508_vm1, %v620_v11  ;;  %v2857_v12 = vpop.f32.mrb[15].mxu0 }
 0x5fe   :  { %v743_v26 = vpop.f32.mrb[16].mxu0 }
 0x5ff   :  { %752 = vrot.lane.b32.xlu0 %v743_v26, %s3425_s27  ;;  %v2868_v14 = vpop.f32.mrb[17].mxu0 }
 0x600   :  { %v746_v31 = vpop.f32.mrb[18].mxu0 }
 0x601   :  { %754 = vrot.lane.b32.xlu1 %v746_v31, %s3425_s27  ;;  %v2869_v42 = vpop.f32.mrb[19].mxu0  ;;  %v3216_v31 = vld [vmem:[#allocation3] sm:$0xff] }
 0x606   :  { %v875_v55 = vpop.f32.mrb[20].mxu0 }
 0x607   :  { %884 = vrot.lane.b32.xlu0 %v875_v55, %s3418_s2  ;;  %v2880_v19 = vpop.f32.mrb[21].mxu0 }
 0x608   :  { %v878_v21 = vpop.f32.mrb[22].mxu0  ;;  %v3217_v19 = vld [vmem:[#allocation3 + $0x8] sm:$0xff] }
 0x609   :  { %886 = vrot.lane.b32.xlu1 %v878_v21, %s3418_s2  ;;  %v2881_v22 = vpop.f32.mrb[23].mxu0 }
 0x60a   :  { %v3218_v22 = vld [vmem:[#allocation3 + $0x10] sm:$0xff] }
 0x60e   :  { %v1007_v27 = vpop.f32.mrb[24].mxu0 }
 0x60f   :  { %1016 = vrot.lane.b32.xlu0 %v1007_v27, %s3424_s4  ;;  %v2892_v28 = vpop.f32.mrb[25].mxu0 }
 0x610   :  { %v1010_v60 = vpop.f32.mrb[26].mxu0 }
 0x611   :  { %1018 = vrot.lane.b32.xlu1 %v1010_v60, %s3424_s4  ;;  %v2893_v13 = vpop.f32.mrb[27].mxu0  ;;  %v3219_v60 = vld [vmem:[#allocation3 + $0x18] sm:$0xff] }
 0x616   :  { %v1132_v32 = vpop.f32.mrb[28].mxu0 }
 0x617   :  { %1139 = vst.msk [vmem:[#allocation2 + $0x10] sm:$0xff] %vm508_vm1, %v1132_v32  ;;  %v2904_v63 = vpop.f32.mrb[29].mxu0  ;;  %v3024_v32 = vld [vmem:[#allocation12] ss:$16 sps:$4 sm:$0xff]  }
 0x618   :  { %v1135_v34 = vpop.f32.mrb[30].mxu0  ;;  %v3026_v63 = vld [vmem:[#allocation12 + $0x4] ss:$16 sps:$4 sm:$0xff]  }
 0x619   :  { %1140 = vst.msk [vmem:[#allocation2 + $0x18] sm:$0xff] %vm508_vm1, %v1135_v34  ;;  %v2905_v37 = vpop.f32.mrb[31].mxu0  ;;  %v3027_v34 = vld [vmem:[#allocation12 + $0x8] ss:$16 sps:$4 sm:$0xff]   ;;  %1949 = vmatprep.subr.bf16.mxu0 %v3026_v63 }
 0x61a   :  { %v3029_v37 = vld [vmem:[#allocation12 + $0xc] ss:$16 sps:$4 sm:$0xff]   ;;  %1950 = vmatpush1.bf16.msra.mxu0 %v3024_v32 }
 0x61b   :  { %2002 = vmatprep.subr.bf16.mxu1 %v3029_v37  ;;  %1951 = vmatprep.subr.bf16.mxu0 %v3032_v1 }
 0x61e   :  { %1952 = vmatpush1.bf16.msra.mxu0 %v3030_v41  ;;  %v2651_v41 = vld [vmem:[%s4154_s7] ss:$0 sm:$0xff] }
 0x626   :  { %v1258_v43 = vpop.f32.mrb[32].mxu0 }
 0x627   :  { %1267 = vrot.lane.b32.xlu0 %v1258_v43, %s3425_s27  ;;  %v2916_v9 = vpop.f32.mrb[33].mxu0  ;;  %v3033_v43 = vld [vmem:[#allocation12 + $0x28] ss:$16 sps:$4 sm:$0xff]  }
 0x628   :  { %v1261_v48 = vpop.f32.mrb[34].mxu0 }
 0x629   :  { %1269 = vrot.lane.b32.xlu1 %v1261_v48, %s3425_s27  ;;  %v2917_v50 = vpop.f32.mrb[35].mxu0 }
 0x647   :  { %v1389_v51 = vpop.f32.mrb[36].mxu0 }
 0x648   :  { %1398 = vrot.lane.b32.xlu0 %v1389_v51, %s3418_s2  ;;  %v2928_v54 = vpop.f32.mrb[37].mxu0 }
 0x649   :  { %v1392_v57 = vpop.f32.mrb[38].mxu0 }
 0x64a   :  { %1400 = vrot.lane.b32.xlu1 %v1392_v57, %s3418_s2  ;;  %v2929_v30 = vpop.f32.mrb[39].mxu0 }
 0x64f   :  { %v1520_v24 = vpop.f32.mrb[40].mxu0 }
 0x650   :  { %1529 = vrot.lane.b32.xlu0 %v1520_v24, %s3424_s4  ;;  %v2940_v58 = vpop.f32.mrb[41].mxu0 }
 0x651   :  { %v1523_v46 = vpop.f32.mrb[42].mxu0 }
 0x652   :  { %1531 = vrot.lane.b32.xlu1 %v1523_v46, %s3424_s4  ;;  %v2941_v29 = vpop.f32.mrb[43].mxu0 }
 0x671   :  { %v753_v59 = vpop.permute.xlu0 %752 }
 0x672   :  { %759 = vst.msk [vmem:[#allocation2] sm:$0xff] %vm758_vm5, %v753_v59  ;;  %v3038_v59 = vld [vmem:[#allocation12 + $0x44] ss:$16 sps:$4 sm:$0xff]  }
 0x673   :  { %v755_v61 = vpop.permute.xlu1 %754  ;;  %1953 = vmatprep.subr.bf16.mxu0 %v3038_v59 }
 0x674   :  { %760 = vst.msk [vmem:[#allocation2 + $0x8] sm:$0xff] %vm758_vm5, %v755_v61  ;;  %v3041_v61 = vld [vmem:[#allocation12 + $0x4c] ss:$16 sps:$4 sm:$0xff]  }
 0x679   :  { %v885_v47 = vpop.permute.xlu0 %884 }
 0x67a   :  { %891 = vst.msk [vmem:[#allocation2] sm:$0xff] %vm890_vm6, %v885_v47  ;;  %v3036_v47 = vld [vmem:[#allocation12 + $0x40] ss:$16 sps:$4 sm:$0xff]  }
 0x67b   :  { %v887_v62 = vpop.permute.xlu1 %886  ;;  %1954 = vmatpush1.bf16.msra.mxu0 %v3036_v47 }
 0x67c   :  { %892 = vst.msk [vmem:[#allocation2 + $0x8] sm:$0xff] %vm890_vm6, %v887_v62  ;;  %v3039_v62 = vld [vmem:[#allocation12 + $0x48] ss:$16 sps:$4 sm:$0xff]  }
 0x681   :  { %v1017_v0 = vpop.permute.xlu0 %1016 }
 0x682   :  { %1023 = vst.msk [vmem:[#allocation2] sm:$0xff] %vm1022_vm7, %v1017_v0  ;;  %v3044_v0 = vld [vmem:[#allocation12 + $0x64] ss:$16 sps:$4 sm:$0xff]  }
 0x683   :  { %v1019_v38 = vpop.permute.xlu1 %1018  ;;  %1955 = vmatprep.subr.bf16.mxu0 %v3044_v0  ;;  %v3073_v0 = vld [vmem:[#allocation14 + $0xc0] sm:$0xff]  }
 0x684   :  { %1024 = vst.msk [vmem:[#allocation2 + $0x8] sm:$0xff] %vm1022_vm7, %v1019_v38  ;;  %v3047_v38 = vld [vmem:[#allocation12 + $0x6c] ss:$16 sps:$4 sm:$0xff]  }
 0x689   :  { %v1537_v2 = vld [vmem:[#allocation2] sm:$0xff] }
 0x68b   :  { %v1538_v36 = vld [vmem:[#allocation2 + $0x8] sm:$0xff] }
 0x68c   :  { %v1541_v25 = vpack.c.bf16 %v1538_v36, %v1537_v2  ;;  %v3042_v2 = vld [vmem:[#allocation12 + $0x60] ss:$16 sps:$4 sm:$0xff]   ;;  %v3045_v36 = vld [vmem:[#allocation12 + $0x68] ss:$16 sps:$4 sm:$0xff]  }
 0x68d   :  { %1956 = vmatpush1.bf16.msra.mxu0 %v3042_v2  ;;  %v3077_v2 = vld [vmem:[#allocation14 + $0xc8] sm:$0xff]  }
 0x68e   :  { %2958 = vmatprep.mubr.bf16.mxu1 %v1541_v25  ;;  %v3050_v25 = vld [vmem:[#allocation12 + $0x84] ss:$16 sps:$4 sm:$0xff]  }
 0x68f   :  { %1957 = vmatprep.subr.bf16.mxu0 %v3050_v25  ;;  %v3079_v25 = vld [vmem:[#allocation14 + $0x88] sm:$0xff]  }
 0x699   :  { %v1268_v56 = vpop.permute.xlu0 %1267 }
 0x69a   :  { %1273 = vst.msk [vmem:[#allocation2 + $0x10] sm:$0xff] %vm758_vm5, %v1268_v56  ;;  %v3053_v56 = vld [vmem:[#allocation12 + $0x8c] ss:$16 sps:$4 sm:$0xff]  }
 0x69b   :  { %v1270_v40 = vpop.permute.xlu1 %1269 }
 0x69c   :  { %1274 = vst.msk [vmem:[#allocation2 + $0x18] sm:$0xff] %vm758_vm5, %v1270_v40  ;;  %v3048_v40 = vld [vmem:[#allocation12 + $0x80] ss:$16 sps:$4 sm:$0xff]  }
 0x69d   :  { %1958 = vmatpush1.bf16.msra.mxu0 %v3048_v40  ;;  %v3082_v40 = vld [vmem:[#allocation14 + $0x10] sm:$0xff]  }
 0x6ba   :  { %v1399_v3 = vpop.permute.xlu0 %1398 }
 0x6bb   :  { %1404 = vst.msk [vmem:[#allocation2 + $0x10] sm:$0xff] %vm890_vm6, %v1399_v3  ;;  %v3051_v3 = vld [vmem:[#allocation12 + $0x88] ss:$16 sps:$4 sm:$0xff]  }
 0x6bc   :  { %v1401_v44 = vpop.permute.xlu1 %1400 }
 0x6bd   :  { %1405 = vst.msk [vmem:[#allocation2 + $0x18] sm:$0xff] %vm890_vm6, %v1401_v44  ;;  %v3056_v44 = vld [vmem:[#allocation12 + $0xa4] ss:$16 sps:$4 sm:$0xff]  }
 0x6be   :  { %1959 = vmatprep.subr.bf16.mxu0 %v3056_v44  ;;  %v3084_v44 = vld [vmem:[#allocation14 + $0x58] sm:$0xff]  }
 0x6c2   :  { %v1530_v5 = vpop.permute.xlu0 %1529 }
 0x6c3   :  { %1535 = vst.msk [vmem:[#allocation2 + $0x10] sm:$0xff] %vm1022_vm7, %v1530_v5  ;;  %v3059_v5 = vld [vmem:[#allocation12 + $0xac] ss:$16 sps:$4 sm:$0xff]  }
 0x6c4   :  { %v1532_v45 = vpop.permute.xlu1 %1531 }
 0x6c5   :  { %1536 = vst.msk [vmem:[#allocation2 + $0x18] sm:$0xff] %vm1022_vm7, %v1532_v45  ;;  %v3054_v45 = vld [vmem:[#allocation12 + $0xa0] ss:$16 sps:$4 sm:$0xff]  }
 0x6c6   :  { %1960 = vmatpush1.bf16.msra.mxu0 %v3054_v45  ;;  %v3086_v45 = vld [vmem:[#allocation14 + $0x18] sm:$0xff]  }
 0x6ca   :  { %v1539_v35 = vld [vmem:[#allocation2 + $0x10] sm:$0xff] }
 0x6cc   :  { %v1540_v6 = vld [vmem:[#allocation2 + $0x18] sm:$0xff] }
 0x6cd   :  { %v1542_v8 = vpack.c.bf16 %v1540_v6, %v1539_v35  ;;  %v3057_v35 = vld [vmem:[#allocation12 + $0xa8] ss:$16 sps:$4 sm:$0xff]   ;;  %v3060_v6 = vld [vmem:[#allocation12 + $0xc0] ss:$16 sps:$4 sm:$0xff]  }
 0x6cf   :  { %2959 = vmatmul.mubr.bf16.vlgmr.msra.gmra.mrb[32].mxu1 %v1542_v8  ;;  %v3062_v8 = vld [vmem:[#allocation12 + $0xc4] ss:$16 sps:$4 sm:$0xff]  }
 0x6d0   :  { %2034 = vmatprep.mubr.bf16.mxu1 %v3421_v39  ;;  %2003 = vmatpush1.bf16.msra.mxu1 %v3027_v34 }
 0x6d1   :  { %2004 = vmatprep.subr.bf16.mxu1 %v3035_v4  ;;  %1961 = vmatprep.subr.bf16.mxu0 %v3062_v8  ;;  %v3089_v8 = vld [vmem:[#allocation14 + $0xe0] sm:$0xff]  }
 0x6d2   :  { %1962 = vmatpush1.bf16.msra.mxu0 %v3060_v6  ;;  %v3088_v6 = vld [vmem:[#allocation14 + $0x60] sm:$0xff]  }
 0x6d4   :  { %2005 = vmatpush1.bf16.msra.mxu1 %v3033_v43 }
 0x6d5   :  { %2006 = vmatprep.subr.bf16.mxu1 %v3041_v61 }
 0x6d8   :  { %2007 = vmatpush1.bf16.msra.mxu1 %v3039_v62  ;;  %v3072_v62 = vld [vmem:[#allocation14 + $0x40] sm:$0xff]  }
 0x6d9   :  { %2008 = vmatprep.subr.bf16.mxu1 %v3047_v38  ;;  %v3075_v38 = vld [vmem:[#allocation14 + $0x80] sm:$0xff]  }
 0x6dc   :  { %2009 = vmatpush1.bf16.msra.mxu1 %v3045_v36  ;;  %v3078_v36 = vld [vmem:[#allocation14 + $0x8] sm:$0xff]  }
 0x6dd   :  { %2010 = vmatprep.subr.bf16.mxu1 %v3053_v56  ;;  %v3081_v56 = vld [vmem:[#allocation14 + $0xd0] sm:$0xff]  }
 0x6e0   :  { %2011 = vmatpush1.bf16.msra.mxu1 %v3051_v3  ;;  %v3083_v3 = vld [vmem:[#allocation14 + $0x90] sm:$0xff]  }
 0x6e1   :  { %2012 = vmatprep.subr.bf16.mxu1 %v3059_v5  ;;  %v3085_v5 = vld [vmem:[#allocation14 + $0xd8] sm:$0xff]  }
 0x6e4   :  { %2013 = vmatpush1.bf16.msra.mxu1 %v3057_v35  ;;  %v3087_v35 = vld [vmem:[#allocation14 + $0x98] sm:$0xff]  }
 0x7a2   :  { %v2960_v33 = vpop.f32.mrb[32].mxu1 }
 0x7a3   :  { %v1648_v49 = vpop.f32.mrb[33].mxu1  ;;  %v1657_v14 = vadd.f32 %v2960_v33, %v2642_v52  ;;  %v3065_v33 = vld [vmem:[#allocation12 + $0xcc] ss:$16 sps:$4 sm:$0xff]  }
 0x7a4   :  { %v1649_v11 = vadd.f32 %v2642_v52, %v1648_v49  ;;  %v2961_v12 = vpop.f32.mrb[34].mxu1  ;;  %v3068_v49 = vld [vmem:[#allocation12 + $0xe4] ss:$16 sps:$4 sm:$0xff]   ;;  %2014 = vmatprep.subr.bf16.mxu1 %v3065_v33 }
 0x7a5   :  { %v1651_v26 = vpop.f32.mrb[35].mxu1  ;;  %v3955_v27 = vadd.f32 %v3218_v22, %v1657_v14  ;;  %v1660_v28 = vadd.f32 %v2961_v12, %v2642_v52  ;;  %v3066_v12 = vld [vmem:[#allocation12 + $0xe0] ss:$16 sps:$4 sm:$0xff]   ;;  %1963 = vmatprep.subr.bf16.mxu0 %v3068_v49  ;;  %v3092_v49 = vld [vmem:[#allocation14 + $0x68] sm:$0xff]  }
 0x7a6   :  { %v3950_v42 = vadd.f32 %v3216_v31, %v1649_v11  ;;  %v1652_v55 = vadd.f32 %v2642_v52, %v1651_v26  ;;  %v3063_v52 = vld [vmem:[#allocation12 + $0xc8] ss:$16 sps:$4 sm:$0xff]   ;;  %v3071_v11 = vld [vmem:[#allocation12 + $0xec] ss:$16 sps:$4 sm:$0xff]   ;;  %1964 = vmatpush1.bf16.msra.mxu0 %v3066_v12  ;;  %v3091_v33 = vld [vmem:[#allocation14 + $0xa0] sm:$0xff]  }
 0x7a7   :  { %v3959_v13 = vadd.f32 %v3219_v60, %v1660_v28  ;;  %2015 = vmatpush1.bf16.msra.mxu1 %v3063_v52  ;;  %v3069_v26 = vld [vmem:[#allocation12 + $0xe8] ss:$16 sps:$4 sm:$0xff]   ;;  %2770 = vmatprep.subr.bf16.mxu0 %v3072_v62  ;;  %v3090_v52 = vld [vmem:[#allocation14 + $0x20] sm:$0xff]  }
 0x7a8   :  { %v3952_v21 = vadd.f32 %v3217_v19, %v1652_v55  ;;  %1669 = vadd.xlane.f32.xlu0 %v3950_v42  ;;  %2016 = vmatprep.subr.bf16.mxu1 %v3071_v11  ;;  %v3093_v11 = vld [vmem:[#allocation14 + $0xe8] sm:$0xff]  }
 0x7a9   :  { %v3094_v12 = vld [vmem:[#allocation14 + $0x28] sm:$0xff]  }
 0x7aa   :  { %1671 = vadd.xlane.f32.xlu1 %v3952_v21 }
 0x7ab   :  { %2017 = vmatpush1.bf16.msra.mxu1 %v3069_v26  ;;  %v3095_v26 = vld [vmem:[#allocation14 + $0xa8] sm:$0xff]  }
 0x7ac   :  { %1673 = vadd.xlane.f32.xlu0 %v3955_v27  ;;  %2798 = vmatprep.subr.bf16.mxu1 %v3073_v0 }
 0x7b0   :  { %1675 = vadd.xlane.f32.xlu0 %v3959_v13 }
 0x835   :  { %v1670_v9 = vpop.xlane.xlu0 %1669 }
 0x836   :  { %v1677_v48 = vmul.f32 0.0078125, %v1670_v9 }
 0x837   :  { %v1672_v50 = vpop.xlane.xlu1 %1671 }
 0x838   :  { %v3963_v10 = vsub.f32 %v3950_v42, %v1677_v48  ;;  %v1678_v7 = vmul.f32 0.0078125, %v1672_v50 }
 0x839   :  { %v1674_v17 = vpop.xlane.xlu0 %1673 }
 0x83a   :  { %v3966_v23 = vsub.f32 %v3952_v21, %v1678_v7  ;;  %v1679_v51 = vmul.f32 0.0078125, %v1674_v17  ;;  %v1685_v53 = vmul.f32 %v3963_v10, %v3963_v10  ;;  %v2652_v17 = vld [vmem:[%s4155_s8] ss:$0 sm:$0xff] }
 0x83c   :  { %v3971_v54 = vsub.f32 %v3955_v27, %v1679_v51  ;;  %1689 = vadd.xlane.f32.xlu0 %v1685_v53  ;;  %v1686_v57 = vmul.f32 %v3966_v23, %v3966_v23 }
 0x83d   :  { %v1676_v30 = vpop.xlane.xlu0 %1675 }
 0x83e   :  { %v1680_v24 = vmul.f32 0.0078125, %v1676_v30  ;;  %1691 = vadd.xlane.f32.xlu1 %v1686_v57  ;;  %v1687_v58 = vmul.f32 %v3971_v54, %v3971_v54 }
 0x840   :  { %v3978_v46 = vsub.f32 %v3959_v13, %v1680_v24  ;;  %1693 = vadd.xlane.f32.xlu0 %v1687_v58 }
 0x842   :  { %v1688_v29 = vmul.f32 %v3978_v46, %v3978_v46 }
 0x844   :  { %1695 = vadd.xlane.f32.xlu1 %v1688_v29 }
 0x8c9   :  { %v1690_v14 = vpop.xlane.xlu0 %1689 }
 0x8ca   :  { %v1697_v31 = vmul.f32 0.0078125, %v1690_v14  ;;  %v3096_v14 = vld [vmem:[#allocation14 + $0x70] sm:$0xff]  }
 0x8cb   :  { %v1692_v55 = vpop.xlane.xlu1 %1691 }
 0x8cc   :  { %v1701_v19 = vadd.f32 1e-05, %v1697_v31  ;;  %v1698_v22 = vmul.f32 0.0078125, %v1692_v55  ;;  %v3097_v31 = vld [vmem:[#allocation14 + $0xf0] sm:$0xff]  }
 0x8cd   :  { %v1694_v28 = vpop.xlane.xlu0 %1693  ;;  %v3098_v55 = vld [vmem:[#allocation14 + $0x30] sm:$0xff]  }
 0x8ce   :  { %3176 = vrsqrt.f32 %v1701_v19  ;;  %v1702_v60 = vadd.f32 1e-05, %v1698_v22  ;;  %v1699_v32 = vmul.f32 0.0078125, %v1694_v28  ;;  %v3099_v19 = vld [vmem:[#allocation14 + $0xb0] sm:$0xff]   ;;  %v3100_v22 = vld [vmem:[#allocation14 + $0x78] sm:$0xff]  }
 0x8cf   :  { %v3101_v28 = vld [vmem:[#allocation14 + $0xf8] sm:$0xff]  }
 0x8d0   :  { %3178 = vrsqrt.f32 %v1702_v60  ;;  %v1703_v63 = vadd.f32 1e-05, %v1699_v32  ;;  %v3102_v60 = vld [vmem:[#allocation14 + $0x38] sm:$0xff]  }
 0x8d1   :  { %v1696_v34 = vpop.xlane.xlu1 %1695  ;;  %v3103_v32 = vld [vmem:[#allocation14 + $0xb8] sm:$0xff]  }
 0x8d2   :  { %3180 = vrsqrt.f32 %v1703_v63  ;;  %v1700_v37 = vmul.f32 0.0078125, %v1696_v34  ;;  %v1767_v63 = vld [vmem:[%s4157_s10] sm:$0xf] }
 0x8d3   :  { %v3999_v34 = vrot.slane %v1767_v63, %v255_v16 }
 0x8d4   :  { %v1704_v1 = vadd.f32 1e-05, %v1700_v37  ;;  %v4003_v37 = vrot.slane %v1767_v63, %v263_v20 }
 0x8d6   :  { %3182 = vrsqrt.f32 %v1704_v1  ;;  %v1783_v1 = vsub.s32 3, %v3632_v15 }
 0x8d8   :  { %v3177_v4 = vpop.eup %3176  ;;  %v4012_v16 = vrot.slane %v1767_v63, %v1783_v1 }
 0x8d9   :  { %v1709_v43 = vmul.f32 %v3177_v4, %v3963_v10 }
 0x8da   :  { %v3179_v9 = vpop.eup %3178 }
 0x8db   :  { %v1710_v48 = vmul.f32 %v3179_v9, %v3966_v23  ;;  %v1719_v50 = vmul.f32 %v2651_v41, %v1709_v43  ;;  %v4008_v43 = vrot.slane %v1767_v63, %v259_v18 }
 0x8dc   :  { %v3181_v7 = vpop.eup %3180 }
 0x8dd   :  { %v1720_v51 = vmul.f32 %v2651_v41, %v1710_v48  ;;  %v1729_v53 = vadd.f32 %v2652_v17, %v1719_v50  ;;  %v1711_v30 = vmul.f32 %v3181_v7, %v3971_v54  ;;  %v3074_v54 = vld [vmem:[#allocation14] sm:$0xff]  }
 0x8df   :  { %v1730_v57 = vadd.f32 %v2652_v17, %v1720_v51  ;;  %v1721_v10 = vmul.f32 %v2651_v41, %v1711_v30 }
 0x8e0   :  { %v3183_v24 = vpop.eup %3182 }
 0x8e1   :  { %v1733_v58 = vpack.c.bf16 %v1730_v57, %v1729_v53  ;;  %v1712_v29 = vmul.f32 %v3183_v24, %v3978_v46  ;;  %v1731_v61 = vadd.f32 %v2652_v17, %v1721_v10  ;;  %v3076_v46 = vld [vmem:[#allocation14 + $0x48] sm:$0xff]  }
 0x8e3   :  { %1982 = vmatmul.mubr.bf16.vlgmr.msra.gmra.mrb[44].mxu0 %v1733_v58  ;;  %2035 = vmatmul.mubr.bf16.vlgmr.msra.gmra.mrb[36].mxu1 %v1733_v58  ;;  %v1722_v59 = vmul.f32 %v2651_v41, %v1712_v29 }
 0x8e4   :  { %1991 = vmatprep.mubr.bf16.mxu0 %v3421_v39  ;;  %2044 = vmatprep.mubr.bf16.mxu1 %v3421_v39  ;;  %v3080_v39 = vld [vmem:[#allocation14 + $0x50] sm:$0xff]  }
 0x8e5   :  { %v1732_v23 = vadd.f32 %v2652_v17, %v1722_v59  ;;  %2771 = vmatpush3.bf16.msra.mxu0 %v3074_v54  ;;  %2799 = vmatpush3.bf16.msra.mxu1 %v3075_v38 }
 0x8e6   :  { %2772 = vmatprep.subr.bf16.mxu0 %v3076_v46  ;;  %2800 = vmatprep.subr.bf16.mxu1 %v3077_v2 }
 0x8e7   :  { %v1734_v47 = vpack.c.bf16 %v1732_v23, %v1731_v61 }
 0x8e9   :  { %2773 = vmatpush3.bf16.msra.mxu0 %v3078_v36  ;;  %2801 = vmatpush3.bf16.msra.mxu1 %v3079_v25 }
 0x8ea   :  { %2774 = vmatprep.subr.bf16.mxu0 %v3080_v39  ;;  %2802 = vmatprep.subr.bf16.mxu1 %v3081_v56 }
 0x8eb   :  { %1992 = vmatmul.mubr.bf16.gmra.mrb[48].mxu0 %v1734_v47  ;;  %2045 = vmatmul.mubr.bf16.gmra.mrb[40].mxu1 %v1734_v47 }
 0x8ed   :  { %2775 = vmatpush3.bf16.msra.mxu0 %v3082_v40  ;;  %2803 = vmatpush3.bf16.msra.mxu1 %v3083_v3 }
 0x8ee   :  { %2776 = vmatprep.subr.bf16.mxu0 %v3084_v44  ;;  %2804 = vmatprep.subr.bf16.mxu1 %v3085_v5 }
 0x8f1   :  { %2777 = vmatpush3.bf16.msra.mxu0 %v3086_v45  ;;  %2805 = vmatpush3.bf16.msra.mxu1 %v3087_v35 }
 0x8f2   :  { %2778 = vmatprep.subr.bf16.mxu0 %v3088_v6  ;;  %2806 = vmatprep.subr.bf16.mxu1 %v3089_v8 }
 0x8f5   :  { %2779 = vmatpush3.bf16.msra.mxu0 %v3090_v52  ;;  %2807 = vmatpush3.bf16.msra.mxu1 %v3091_v33 }
 0x8f6   :  { %2780 = vmatprep.subr.bf16.mxu0 %v3092_v49  ;;  %2808 = vmatprep.subr.bf16.mxu1 %v3093_v11 }
 0x8f9   :  { %2781 = vmatpush3.bf16.msra.mxu0 %v3094_v12  ;;  %2809 = vmatpush3.bf16.msra.mxu1 %v3095_v26 }
 0x8fa   :  { %2782 = vmatprep.subr.bf16.mxu0 %v3096_v14  ;;  %2810 = vmatprep.subr.bf16.mxu1 %v3097_v31 }
 0x8fd   :  { %2783 = vmatpush3.bf16.msra.mxu0 %v3098_v55  ;;  %2811 = vmatpush3.bf16.msra.mxu1 %v3099_v19 }
 0x8fe   :  { %2784 = vmatprep.subr.bf16.mxu0 %v3100_v22  ;;  %2812 = vmatprep.subr.bf16.mxu1 %v3101_v28 }
 0x901   :  { %2785 = vmatpush3.bf16.msra.mxu0 %v3102_v60  ;;  %2813 = vmatpush3.bf16.msra.mxu1 %v3103_v32 }
 0x9b6   :  { %v1983_v4 = vpop.f32.mrb[44].mxu0  ;;  %v2036_v41 = vpop.f32.mrb[36].mxu1 }
 0x9b7   :  { %v1984_v9 = vadd.f32 %v1983_v4, %v3999_v34  ;;  %v2037_v48 = vadd.f32 %v2036_v41, %v4003_v37  ;;  %v1985_v50 = vpop.f32.mrb[45].mxu0  ;;  %v2038_v7 = vpop.f32.mrb[37].mxu1 }
 0x9b8   :  { %v1987_v17 = vpop.f32.mrb[46].mxu0  ;;  %v2040_v51 = vpop.f32.mrb[38].mxu1  ;;  %v4015_v57 = vadd.f32 %v1985_v50, %v4008_v43  ;;  %v4025_v59 = vadd.f32 %v2038_v7, %v4012_v16 }
 0x9b9   :  { %v2071_v20 = vmul.f32 0.044715, %v1984_v9  ;;  %v2073_v53 = vmul.f32 0.044715, %v2037_v48  ;;  %v1988_v30 = vadd.f32 %v1987_v17, %v3999_v34  ;;  %v4019_v15 = vadd.f32 %v2040_v51, %v4003_v37  ;;  %v1989_v18 = vpop.f32.mrb[47].mxu0  ;;  %v2042_v24 = vpop.f32.mrb[39].mxu1 }
 0x9ba   :  { %v4022_v10 = vadd.f32 %v1989_v18, %v4008_v43  ;;  %v4028_v61 = vadd.f32 %v2042_v24, %v4012_v16  ;;  %v4030_v47 = vmul.f32 0.5, %v1984_v9  ;;  %v2072_v38 = vmul.f32 0.044715, %v4015_v57 }
 0x9bb   :  { %v2087_v58 = vmul.f32 %v2071_v20, %v1984_v9  ;;  %v2089_v29 = vmul.f32 %v2073_v53, %v2037_v48  ;;  %v2075_v23 = vmul.f32 0.044715, %v1988_v30  ;;  %v2077_v54 = vmul.f32 0.044715, %v4019_v15 }
 0x9bc   :  { %v2076_v2 = vmul.f32 0.044715, %v4022_v10  ;;  %v4035_v56 = vmul.f32 0.5, %v2037_v48  ;;  %v2074_v45 = vmul.f32 0.044715, %v4025_v59  ;;  %v2088_v31 = vmul.f32 %v2072_v38, %v4015_v57 }
 0x9bd   :  { %v2103_v62 = vmul.f32 %v2087_v58, %v1984_v9  ;;  %v2105_v0 = vmul.f32 %v2089_v29, %v2037_v48  ;;  %v2091_v46 = vmul.f32 %v2075_v23, %v1988_v30  ;;  %v2093_v3 = vmul.f32 %v2077_v54, %v4019_v15 }
 0x9be   :  { %v1993_v36 = vpop.f32.mrb[48].mxu0  ;;  %v2046_v25 = vpop.f32.mrb[40].mxu1  ;;  %v2078_v6 = vmul.f32 0.044715, %v4028_v61  ;;  %v2092_v19 = vmul.f32 %v2076_v2, %v4022_v10  ;;  %v2090_v63 = vmul.f32 %v2074_v45, %v4025_v59  ;;  %v2104_v7 = vmul.f32 %v2088_v31, %v4015_v57 }
 0x9bf   :  { %v2119_v39 = vadd.f32 %v2103_v62, %v1984_v9  ;;  %v2121_v40 = vadd.f32 %v2105_v0, %v2037_v48  ;;  %v1995_v44 = vpop.f32.mrb[49].mxu0  ;;  %v2048_v5 = vpop.f32.mrb[41].mxu1  ;;  %v2107_v35 = vmul.f32 %v2091_v46, %v1988_v30  ;;  %v4041_v8 = vadd.f32 %v1993_v36, %v3999_v34 }
 0x9c0   :  { %v1997_v52 = vpop.f32.mrb[50].mxu0  ;;  %v2050_v33 = vpop.f32.mrb[42].mxu1  ;;  %v2109_v12 = vmul.f32 %v2093_v3, %v4019_v15  ;;  %v4047_v22 = vadd.f32 %v2046_v25, %v4003_v37  ;;  %v4052_v32 = vadd.f32 %v1995_v44, %v4008_v43  ;;  %v2094_v4 = vmul.f32 %v2078_v6, %v4028_v61 }
 0x9c1   :  { %v2135_v49 = vmul.f32 0.7978846, %v2119_v39  ;;  %v2137_v11 = vmul.f32 0.7978846, %v2121_v40  ;;  %v1999_v26 = vpop.f32.mrb[51].mxu0  ;;  %v2052_v14 = vpop.f32.mrb[43].mxu1  ;;  %v2123_v55 = vadd.f32 %v2107_v35, %v1988_v30  ;;  %v4058_v48 = vadd.f32 %v2048_v5, %v4012_v16 }
 0x9c2   :  { %v2125_v28 = vadd.f32 %v2109_v12, %v4019_v15  ;;  %v2079_v60 = vmul.f32 0.044715, %v4041_v8  ;;  %v2080_v9 = vmul.f32 0.044715, %v4052_v32  ;;  %v4061_v50 = vadd.f32 %v1997_v52, %v3999_v34 }
 0x9c3   :  { %3184 = vtanh.f32 %v2135_v49  ;;  %v2139_v1 = vmul.f32 0.7978846, %v2123_v55  ;;  %v2108_v17 = vmul.f32 %v2092_v19, %v4022_v10  ;;  %v4066_v51 = vadd.f32 %v2050_v33, %v4003_v37 }
 0x9c4   :  { %3186 = vtanh.f32 %v2137_v11  ;;  %v2141_v41 = vmul.f32 0.7978846, %v2125_v28  ;;  %v2095_v20 = vmul.f32 %v2079_v60, %v4041_v8  ;;  %v2081_v53 = vmul.f32 0.044715, %v4047_v22 }
 0x9c5   :  { %3188 = vtanh.f32 %v2139_v1  ;;  %v2082_v18 = vmul.f32 0.044715, %v4058_v48  ;;  %v2059_v24 = vmul.f32 0.5, %v1988_v30  ;;  %v2096_v58 = vmul.f32 %v2080_v9, %v4052_v32 }
 0x9c6   :  { %3190 = vtanh.f32 %v2141_v41  ;;  %v4073_v34 = vadd.f32 %v1999_v26, %v4008_v43  ;;  %v4076_v29 = vadd.f32 %v2052_v14, %v4012_v16  ;;  %v2106_v23 = vmul.f32 %v2090_v63, %v4025_v59 }
 0x9c7   :  { %v2110_v37 = vmul.f32 %v2094_v4, %v4028_v61  ;;  %v2083_v62 = vmul.f32 0.044715, %v4061_v50  ;;  %v2085_v0 = vmul.f32 0.044715, %v4066_v51  ;;  %v2098_v54 = vmul.f32 %v2082_v18, %v4058_v48 }
 0x9c8   :  { %v2084_v30 = vmul.f32 0.044715, %v4073_v34  ;;  %v2086_v38 = vmul.f32 0.044715, %v4076_v29  ;;  %v2120_v43 = vadd.f32 %v2104_v7, %v4015_v57  ;;  %v2061_v46 = vmul.f32 0.5, %v4019_v15 }
 0x9c9   :  { %v2111_v16 = vmul.f32 %v2095_v20, %v4041_v8  ;;  %v2097_v2 = vmul.f32 %v2081_v53, %v4047_v22  ;;  %v2124_v36 = vadd.f32 %v2108_v17, %v4022_v10  ;;  %v2112_v25 = vmul.f32 %v2096_v58, %v4052_v32 }
 0x9ca   :  { %v2100_v39 = vmul.f32 %v2084_v30, %v4073_v34  ;;  %v2102_v40 = vmul.f32 %v2086_v38, %v4076_v29  ;;  %v2136_v3 = vmul.f32 0.7978846, %v2120_v43  ;;  %v2099_v5 = vmul.f32 %v2083_v62, %v4061_v50 }
 0x9cb   :  { %v2140_v45 = vmul.f32 0.7978846, %v2124_v36  ;;  %v2122_v35 = vadd.f32 %v2106_v23, %v4025_v59  ;;  %v2126_v15 = vadd.f32 %v2110_v37, %v4028_v61  ;;  %v2114_v52 = vmul.f32 %v2098_v54, %v4058_v48 }
 0x9cc   :  { %v2101_v33 = vmul.f32 %v2085_v0, %v4066_v51  ;;  %v2116_v49 = vmul.f32 %v2100_v39, %v4073_v34  ;;  %3192 = vtanh.f32 %v2136_v3  ;;  %v2113_v31 = vmul.f32 %v2097_v2, %v4047_v22 }
 0x9cd   :  { %v3185_v44 = vpop.eup %3184  ;;  %3194 = vtanh.f32 %v2140_v45  ;;  %v2138_v11 = vmul.f32 0.7978846, %v2122_v35  ;;  %v2142_v12 = vmul.f32 0.7978846, %v2126_v15  ;;  %v2118_v55 = vmul.f32 %v2102_v40, %v4076_v29 }
 0x9ce   :  { %v3187_v6 = vpop.eup %3186  ;;  %v2167_v26 = vadd.f32 1.0, %v3185_v44  ;;  %v2128_v28 = vadd.f32 %v2112_v25, %v4052_v32  ;;  %v2115_v63 = vmul.f32 %v2099_v5, %v4061_v50  ;;  %v2132_v4 = vadd.f32 %v2116_v49, %v4073_v34 }
 0x9cf   :  { %v3189_v14 = vpop.eup %3188  ;;  %v2169_v19 = vadd.f32 1.0, %v3187_v6  ;;  %3196 = vtanh.f32 %v2138_v11  ;;  %v2117_v41 = vmul.f32 %v2101_v33, %v4066_v51  ;;  %v2130_v18 = vadd.f32 %v2114_v52, %v4058_v48 }
 0x9d0   :  { %v3191_v60 = vpop.eup %3190  ;;  %v2171_v1 = vadd.f32 1.0, %v3189_v14  ;;  %3198 = vtanh.f32 %v2142_v12  ;;  %v2144_v7 = vmul.f32 0.7978846, %v2128_v28  ;;  %v2183_v17 = vmul.f32 %v2167_v26, %v4030_v47 }
 0x9d1   :  { %v2173_v9 = vadd.f32 1.0, %v3191_v60  ;;  %v2148_v53 = vmul.f32 0.7978846, %v2132_v4  ;;  %v2185_v58 = vmul.f32 %v2169_v19, %v4035_v56  ;;  %v2134_v37 = vadd.f32 %v2118_v55, %v4076_v29 }
 0x9d2   :  { %v2187_v20 = vmul.f32 %v2171_v1, %v2059_v24  ;;  %3200 = vtanh.f32 %v2144_v7  ;;  %v2146_v0 = vmul.f32 0.7978846, %v2130_v18  ;;  %v2127_v38 = vadd.f32 %v2111_v16, %v4041_v8 }
 0x9d3   :  { %v2189_v23 = vmul.f32 %v2173_v9, %v2061_v46  ;;  %3202 = vtanh.f32 %v2148_v53  ;;  %v2150_v30 = vmul.f32 0.7978846, %v2134_v37  ;;  %v2131_v43 = vadd.f32 %v2115_v63, %v4061_v50 }
 0x9d4   :  { %v2199_v62 = vpack.c.bf16 %v2187_v20, %v2183_v17  ;;  %3204 = vtanh.f32 %v2146_v0  ;;  %v2129_v47 = vadd.f32 %v2113_v31, %v4047_v22  ;;  %v2143_v2 = vmul.f32 0.7978846, %v2127_v38 }
 0x9d5   :  { %v2201_v54 = vpack.c.bf16 %v2189_v23, %v2185_v58  ;;  %3206 = vtanh.f32 %v2150_v30  ;;  %v2147_v56 = vmul.f32 0.7978846, %v2131_v43  ;;  %v2133_v46 = vadd.f32 %v2117_v41, %v4066_v51 }
 0x9d6   :  { %v3193_v24 = vpop.eup %3192  ;;  %v2056_v25 = vmul.f32 0.5, %v4015_v57  ;;  %v2145_v40 = vmul.f32 0.7978846, %v2129_v47  ;;  %v2060_v3 = vmul.f32 0.5, %v4022_v10  ;;  %3208 = vtanh.f32 %v2143_v2 }
 0x9d7   :  { %v3195_v36 = vpop.eup %3194  ;;  %v2168_v39 = vadd.f32 1.0, %v3193_v24  ;;  %v2149_v16 = vmul.f32 0.7978846, %v2133_v46  ;;  %3210 = vtanh.f32 %v2147_v56  ;;  %v2058_v52 = vmul.f32 0.5, %v4025_v59 }
 0x9d8   :  { %v2172_v44 = vadd.f32 1.0, %v3195_v36  ;;  %3212 = vtanh.f32 %v2145_v40  ;;  %v2062_v33 = vmul.f32 0.5, %v4028_v61  ;;  %v2064_v31 = vmul.f32 0.5, %v4052_v32 }
 0x9d9   :  { %v3197_v5 = vpop.eup %3196  ;;  %v2184_v35 = vmul.f32 %v2168_v39, %v2056_v25  ;;  %3214 = vtanh.f32 %v2149_v16  ;;  %v2068_v55 = vmul.f32 0.5, %v4073_v34  ;;  %v2066_v4 = vmul.f32 0.5, %v4058_v48 }
 0x9da   :  { %v3199_v45 = vpop.eup %3198  ;;  %v2188_v15 = vmul.f32 %v2172_v44, %v2060_v3  ;;  %v2170_v6 = vadd.f32 1.0, %v3197_v5  ;;  %v2070_v41 = vmul.f32 0.5, %v4076_v29  ;;  %v2063_v58 = vmul.f32 0.5, %v4041_v8 }
 0x9db   :  { %v2174_v49 = vadd.f32 1.0, %v3199_v45  ;;  %v2067_v23 = vmul.f32 0.5, %v4061_v50  ;;  %v2065_v48 = vmul.f32 0.5, %v4047_v22  ;;  %v2717_v45 = vld [vmem:[%s4159_s12] ss:$0 sm:$0xff]  ;;  %s3427_s12 = smov [#allocation15]  }
 0x9dc   :  { %v3201_v57 = vpop.eup %3200  ;;  %v2200_v11 = vpack.c.bf16 %v2188_v15, %v2184_v35  ;;  %v2186_v10 = vmul.f32 %v2170_v6, %v2058_v52  ;;  %s2585_s26 = sshll.u32 %s3427_s12, 4  ;;  %s2586_s26 = int_to_ptr.vmem [resolvable:$true] %s2585_s26 }
 0x9dd   :  { %v3203_v12 = vpop.eup %3202  ;;  %v2190_v26 = vmul.f32 %v2174_v49, %v2062_v33  ;;  %v2176_v14 = vadd.f32 1.0, %v3201_v57  ;;  %s3374_s16 = scalar_lea.vmem %s2586_s26, 512  ;;  %p3379_p1 = scmp.lt.s32.totalorder %s2586_s26, %s2586_s26 }
 0x9de   :  { %2495 = vmatprep.mubr.bf16.mxu0 %v2200_v11  ;;  %v2180_v19 = vadd.f32 1.0, %v3203_v12  ;;  %v3205_v28 = vpop.eup %3204  ;;  %p3375_p0 = scmp.ne.s32.totalorder %s2586_s26, %s3374_s16  ;;  %p3380_p2 = scmp.lt.s32.totalorder %s3374_s16, %s3374_s16 }
 0x9df   :  { %v2202_v60 = vpack.c.bf16 %v2190_v26, %v2186_v10  ;;  %2496 = vmatmul.mubr.bf16.vlgmr.msra.gmra.mrb[52].mxu0 %v2199_v62  ;;  %v3207_v59 = vpop.eup %3206  ;;  %v2192_v63 = vmul.f32 %v2176_v14, %v2064_v31  ;;  %v2178_v1 = vadd.f32 1.0, %v3205_v28 }
 0x9e0   :  { %v2196_v61 = vmul.f32 %v2180_v19, %v2068_v55  ;;  %v2182_v9 = vadd.f32 1.0, %v3207_v59  ;;  %v3209_v7 = vpop.eup %3208  ;;  %p3381_p3 = por %p3380_p2, %p3379_p1 }
 0x9e1   :  { %2544 = vmatprep.mubr.bf16.mxu1 %v2202_v60  ;;  %v3211_v32 = vpop.eup %3210  ;;  %v2194_v20 = vmul.f32 %v2178_v1, %v2066_v4  ;;  %v2175_v53 = vadd.f32 1.0, %v3209_v7 }
 0x9e2   :  { %2545 = vmatmul.mubr.bf16.vlgmr.msra.gmra.mrb[44].mxu1 %v2201_v54  ;;  %v2204_v17 = vpack.c.bf16 %v2196_v61, %v2192_v63  ;;  %v2198_v34 = vmul.f32 %v2182_v9, %v2070_v41  ;;  %v3213_v18 = vpop.eup %3212  ;;  %v2179_v37 = vadd.f32 1.0, %v3211_v32  ;;  %v2069_v54 = vmul.f32 0.5, %v4066_v51  ;;  %p3382_p4 = pnand %p3381_p3, %p3375_p0 }
 0x9e3   :  { %v3215_v62 = vpop.eup %3214  ;;  %v2177_v29 = vadd.f32 1.0, %v3213_v18  ;;  %v2191_v30 = vmul.f32 %v2175_v53, %v2063_v58 }
 0x9e4   :  { %2503 = vmatprep.mubr.bf16.mxu0 %v2204_v17  ;;  %v2206_v0 = vpack.c.bf16 %v2198_v34, %v2194_v20  ;;  %v2195_v38 = vmul.f32 %v2179_v37, %v2067_v23  ;;  %v2181_v43 = vadd.f32 1.0, %v3215_v62 }
 0x9e5   :  { %v2193_v24 = vmul.f32 %v2177_v29, %v2065_v48 }
 0x9e6   :  { %2552 = vmatprep.mubr.bf16.mxu1 %v2206_v0  ;;  %v2203_v47 = vpack.c.bf16 %v2195_v38, %v2191_v30  ;;  %v2197_v2 = vmul.f32 %v2181_v43, %v2069_v54 }
 0x9e8   :  { %2504 = vmatmul.mubr.bf16.gmra.mrb[56].mxu0 %v2203_v47  ;;  %v2205_v56 = vpack.c.bf16 %v2197_v2, %v2193_v24 }
 0x9ea   :  { %2553 = vmatmul.mubr.bf16.gmra.mrb[48].mxu1 %v2205_v56 }
 0xab2   :  { %v2786_v8 = vpop.f32.mrb[52].mxu0 }
 0xab3   :  { %v2787_v50 = vpop.f32.mrb[53].mxu0 }
 0xab4   :  { %v2788_v46 = vadd.f32 %v2787_v50, %v2786_v8  ;;  %v2789_v36 = vpop.f32.mrb[54].mxu0 }
 0xab5   :  { %v2814_v25 = vpop.f32.mrb[44].mxu1  ;;  %v2790_v39 = vpop.f32.mrb[55].mxu0 }
 0xab6   :  { %v2815_v22 = vpop.f32.mrb[45].mxu1  ;;  %v2791_v40 = vadd.f32 %v2790_v39, %v2789_v36 }
 0xab7   :  { %v2816_v3 = vadd.f32 %v2815_v22, %v2814_v25  ;;  %v2817_v44 = vpop.f32.mrb[46].mxu1 }
 0xab8   :  { %v2818_v16 = vpop.f32.mrb[47].mxu1 }
 0xab9   :  { %v2547_v51 = vadd.f32 %v2816_v3, %v2788_v46  ;;  %v2819_v5 = vadd.f32 %v2818_v16, %v2817_v44 }
 0xabb   :  { %v2561_v35 = vadd.f32 %v2547_v51, %v3950_v42  ;;  %v2550_v15 = vadd.f32 %v2819_v5, %v2791_v40  ;;  %v2792_v33 = vpop.f32.mrb[56].mxu0 }
 0xabc   :  { %v2793_v49 = vpop.f32.mrb[57].mxu0 }
 0xabd   :  { %v2572_v6 = vadd.f32 %v2717_v45, %v2561_v35  ;;  %v2562_v52 = vadd.f32 %v2550_v15, %v3952_v21  ;;  %v2820_v11 = vpop.f32.mrb[48].mxu1  ;;  %v2794_v12 = vadd.f32 %v2793_v49, %v2792_v33  ;;  %v2795_v10 = vpop.f32.mrb[58].mxu0 }
 0xabe   :  { %v2821_v26 = vpop.f32.mrb[49].mxu1  ;;  %v2796_v14 = vpop.f32.mrb[59].mxu0 }
 0xabf   :  { %2576 = vst [vmem:[#allocation15] sm:$0xff] %v2572_v6  ;;  %v2573_v57 = vadd.f32 %v2717_v45, %v2562_v52  ;;  %v2822_v31 = vadd.f32 %v2821_v26, %v2820_v11  ;;  %v2823_v55 = vpop.f32.mrb[50].mxu1  ;;  %v2797_v19 = vadd.f32 %v2796_v14, %v2795_v10 }
 0xac0   :  { %v2824_v28 = vpop.f32.mrb[51].mxu1 }
 0xac1   :  { %2577 = vst [vmem:[#allocation15 + $0x8] sm:$0xff] %v2573_v57  ;;  %v2555_v60 = vadd.f32 %v2822_v31, %v2794_v12  ;;  %v2825_v42 = vadd.f32 %v2824_v28, %v2823_v55 }
 0xac3   :  { %v2563_v59 = vadd.f32 %v2555_v60, %v3955_v27  ;;  %v2558_v63 = vadd.f32 %v2825_v42, %v2797_v19 }
 0xac5   :  { %v2574_v21 = vadd.f32 %v2717_v45, %v2563_v59  ;;  %v2564_v61 = vadd.f32 %v2558_v63, %v3959_v13 }
 0xac7   :  { %2578 = vst [vmem:[#allocation15 + $0x10] sm:$0xff] %v2574_v21  ;;  %v2575_v1 = vadd.f32 %v2717_v45, %v2564_v61 }
 0xac9   :  { %2579 = vst [vmem:[#allocation15 + $0x18] sm:$0xff] %v2575_v1 }
 0xaca   :  { %3385 = shalt.err (!%p3382_p4)
}
 0xacb   :  { %s3386_s0 = scalar_lea.hbm %s4160_s13, 512 }
 0xacc   :  { %p3387_p5 = scmp.ne.s32.totalorder %s4160_s13, %s3386_s0  ;;  %p3390_p6 = scmp.lt.u32.totalorder %s3386_s0, %s4160_s13 }
 0xace   :  { %p3392_p7 = pnand %p3390_p6, %p3387_p5 }
 0xad0   :  { %3395 = shalt.err (!%p3392_p7)
}
 0xad1   :  { %2591 = dma.vmem_to_hbm [thread:$0]  %s2586_s26, 512, %s4160_s13, [#allocation5], %s3414_s9, %s3414_s9, %s3415_s19  }
 0xad2   :  { %3404 = dma.done.wait [#allocation5], 512  }
 0xad3   :  { %3405 = vsyncadd [#allocation5], 4294966784 }
 0xad4   :  { %2595 = vsyncpa [#allocation4], 1 }
 0xad5   :  { %2596 = vsyncpa [#allocation7], 1 }
 0xad6   :  { %2597 = vsyncpa [#allocation10], 1 }
 0xad7   :  { %2598 = vsyncpa [#allocation13], 1 }
 0xad8   :  { %2599 = vsyncpa [#allocation5], 1 }

</bundles_post_ra>
